<compile_context>
chip_gen: v5e
topology: v5e:2x2
jax: 0.10.0
libtpu: 0.0.40
codegen_flags: <defaults>
</compile_context>

<pallas_src>
import functools

import numpy as np
import jax
import jax.numpy as jnp
from jax.experimental import pallas as pl
from jax.experimental.pallas import tpu as pltpu

# ----------------------------- tiny T5 config -------------------------------
VOCAB = 100
D_MODEL = 32          # hidden_size
D_FF = 64
N_HEADS = 4
D_HEAD = 8            # N_HEADS * D_HEAD == inner dim == D_MODEL here
INNER = N_HEADS * D_HEAD
N_LAYERS = 2
NUM_BUCKETS = 32
MAX_DISTANCE = 128
NUM_CLASSES = 3
PAD_CLASSES = 128     # lane-dense padded logits width
EPS = 1e-6            # T5LayerNorm eps
NEG_INF = -1e9


# ------------------------------ fused kernel --------------------------------
def _rms(x, g):
    """T5LayerNorm: no mean subtraction, no bias (f32)."""
    var = jnp.mean(x * x, axis=-1, keepdims=True)
    return x * jax.lax.rsqrt(var + EPS) * g


def _make_encoder_kernel(B, S):
    BS = B * S

    def kernel(ids_ref, emb_ref, maskb_ref, pbias_ref,
               wqkv_ref, wo_ref, wi_ref, woff_ref,
               ln_ref, fc_ref, out_ref):
        # ---- token embedding, gather-free: one-hot @ embedding table ------
        ids = ids_ref[...]                                        # (BS, 1) i32
        vocab_iota = jax.lax.broadcasted_iota(jnp.int32, (BS, VOCAB), 1)
        onehot = (vocab_iota == ids).astype(jnp.float32)          # (BS, VOCAB)
        hidden = jnp.dot(onehot, emb_ref[...],
                         preferred_element_type=jnp.float32)      # (BS, D) f32

        # ---- pre-combine rel-pos bias + pad-mask bias once, reuse both layers
        mask_bias = maskb_ref[...]                                # (B, 1, S)
        bias = [pbias_ref[h][None, :, :] + mask_bias              # (B, S, S)
                for h in range(N_HEADS)]

        for layer in range(N_LAYERS):
            # ------------------- self-attention -------------------
            x2 = _rms(hidden, ln_ref[2 * layer]).astype(jnp.bfloat16)
            # one fused QKV matmul per layer: (BS,32) @ (32,96)
            qkv = jnp.dot(x2, wqkv_ref[layer],
                          preferred_element_type=jnp.float32)     # (BS, 96)

            o_heads = []
            for h in range(N_HEADS):
                def col(t):       # q/k/v column block for this head
                    lo = t * INNER + h * D_HEAD
                    return qkv[:, lo:lo + D_HEAD]
                q = col(0).astype(jnp.bfloat16).reshape(B, S, D_HEAD)
                k = col(1).astype(jnp.bfloat16).reshape(B, S, D_HEAD)
                v = col(2).astype(jnp.bfloat16).reshape(B, S, D_HEAD)
                # T5: no 1/sqrt(d) scaling; additive bias pre-combined above
                s = jnp.einsum("bqd,bkd->bqk", q, k,
                               preferred_element_type=jnp.float32) + bias[h]
                m = jnp.max(s, axis=-1, keepdims=True)
                p = jnp.exp(s - m)
                p = p * pl.reciprocal(jnp.sum(p, axis=-1, keepdims=True),
                                      approx=True)
                o = jnp.einsum("bqk,bkd->bqd", p.astype(jnp.bfloat16), v,
                               preferred_element_type=jnp.float32)  # (B,S,Dh)
                o_heads.append(o.reshape(BS, D_HEAD))

            # concat heads -> one output projection matmul (BS,32)@(32,32)
            o_cat = jnp.concatenate(o_heads, axis=-1)              # (BS, INNER)
            hidden = hidden + jnp.dot(o_cat.astype(jnp.bfloat16),
                                      wo_ref[layer],
                                      preferred_element_type=jnp.float32)

            # ------------------- feed-forward ---------------------
            x2 = _rms(hidden, ln_ref[2 * layer + 1]).astype(jnp.bfloat16)
            hff = jnp.maximum(
                jnp.dot(x2, wi_ref[layer],
                        preferred_element_type=jnp.float32), 0.0)   # ReLU, f32
            hidden = hidden + jnp.dot(hff.astype(jnp.bfloat16),
                                      woff_ref[layer],
                                      preferred_element_type=jnp.float32)

        # final encoder RMSNorm
        hidden = _rms(hidden, ln_ref[2 * N_LAYERS])                 # (BS, D)

        # classification head: position-0 selection via one-hot matmul + fc.
        row = jax.lax.broadcasted_iota(jnp.int32, (B, BS), 0)
        col = jax.lax.broadcasted_iota(jnp.int32, (B, BS), 1)
        sel = (col == row * S).astype(jnp.float32)                  # (B, BS)
        cls = jnp.dot(sel, hidden, preferred_element_type=jnp.float32)  # (B,D)
        out_ref[...] = (jnp.dot(cls, fc_ref[0:D_MODEL, :],
                                preferred_element_type=jnp.float32)
                        + fc_ref[D_MODEL:D_MODEL + 1, :])           # (B, 128)

    return kernel


# --------------------------- host-side constants -----------------------------
@functools.lru_cache(maxsize=None)
def _position_buckets(seq_len, num_buckets=NUM_BUCKETS, max_distance=MAX_DISTANCE):
    """Bidirectional T5 relative-position buckets; pure function of S,
    computed once on host (numpy) and cached."""
    ctx = np.arange(seq_len, dtype=np.int64)[:, None]
    mem = np.arange(seq_len, dtype=np.int64)[None, :]
    rel = mem - ctx
    nb = num_buckets // 2
    buckets = (rel > 0).astype(np.int32) * nb
    rel_abs = np.abs(rel)
    max_exact = nb // 2
    is_small = rel_abs < max_exact
    rel_f = np.maximum(rel_abs.astype(np.float32), 1.0)
    rel_large = max_exact + (
        np.log(rel_f / max_exact) / np.log(max_distance / max_exact)
        * (nb - max_exact)).astype(np.int32)
    rel_large = np.minimum(rel_large, nb - 1)
    buckets = buckets + np.where(is_small, rel_abs.astype(np.int32), rel_large)
    return buckets.astype(np.int32)                                # (S, S)


# ------------------------------ parameters ----------------------------------
def init_params(key):
    def normal(k, shape, scale=0.02):
        return scale * jax.random.normal(k, shape, dtype=jnp.float32)

    keys = iter(jax.random.split(key, 10))
    L = N_LAYERS

    wq = normal(next(keys), (L, D_MODEL, INNER))
    wk = normal(next(keys), (L, D_MODEL, INNER))
    wv = normal(next(keys), (L, D_MODEL, INNER))
    wo = normal(next(keys), (L, INNER, D_MODEL))
    fc_w = normal(next(keys), (D_MODEL, NUM_CLASSES))

    fc_w_pad = jnp.zeros((D_MODEL, PAD_CLASSES), jnp.float32)
    fc_w_pad = fc_w_pad.at[:, :NUM_CLASSES].set(fc_w)
    fc_b_pad = jnp.zeros((1, PAD_CLASSES), jnp.float32)             # bias = 0

    return {
        "embedding": normal(next(keys), (VOCAB, D_MODEL), 1.0),     # f32
        "rel_bias": normal(next(keys), (NUM_BUCKETS, N_HEADS)),     # f32
        # stacked & bf16 MXU weights
        "wqkv": jnp.concatenate([wq, wk, wv], axis=-1).astype(jnp.bfloat16),
        "wo": wo.astype(jnp.bfloat16),                               # (L,32,32)
        "wi": normal(next(keys), (L, D_MODEL, D_FF)).astype(jnp.bfloat16),
        "wo_ff": normal(next(keys), (L, D_FF, D_MODEL)).astype(jnp.bfloat16),
        # all RMSNorm gains stacked: [ln1_l, ln2_l]*L + [final]
        "ln_all": jnp.ones((2 * L + 1, 1, D_MODEL), jnp.float32),
        # fc weight (rows 0..D-1) + bias (row D), lane-padded to 128
        "fc": jnp.concatenate([fc_w_pad, fc_b_pad], axis=0),        # (D+1,128)
    }


# ------------------------------ forward pass --------------------------------
@jax.jit
def model_forward(params, input_ids, attention_mask):
    B, S = input_ids.shape

    ids2d = input_ids.reshape(B * S, 1).astype(jnp.int32)

    # TODO(synk): the (S,S)->(NUM_BUCKETS) rel-pos embedding gather and the
    # tiny mask scaling stay as XLA glue (data-dependent integer gather).
    buckets = _position_buckets(S)                                   # host const
    pos_bias = jnp.transpose(params["rel_bias"][buckets], (2, 0, 1))  # (H,S,S)
    mask_bias = ((1.0 - attention_mask.astype(jnp.float32))
                 * NEG_INF)[:, None, :]                               # (B,1,S)

    vmem = pl.BlockSpec(memory_space=pltpu.MemorySpace.VMEM)
    logits_pad = pl.pallas_call(
        _make_encoder_kernel(B, S),
        out_shape=jax.ShapeDtypeStruct((B, PAD_CLASSES), jnp.float32),
        in_specs=[vmem] * 10,
        out_specs=vmem,
    )(ids2d, params["embedding"], mask_bias, pos_bias,
      params["wqkv"], params["wo"], params["wi"], params["wo_ff"],
      params["ln_all"], params["fc"])

    return logits_pad[:, :NUM_CLASSES]                                # (B, C)


# ------------------------------------ main -----------------------------------
if __name__ == "__main__":
    key = jax.random.PRNGKey(0)
    k_param, k_ids = jax.random.split(key)

    params = init_params(k_param)

    B, S = 2, 8
    input_ids = jax.random.randint(k_ids, (B, S), 0, VOCAB, dtype=jnp.int32)
    seq_len = jnp.array([8, 6], dtype=jnp.int32)
    attention_mask = (jnp.arange(S, dtype=jnp.int32)[None, :]
                      < seq_len[:, None]).astype(jnp.int32)
    x = (input_ids, seq_len, attention_mask)

    ids, _sl, mask = x
    out = model_forward(params, ids, mask)
    out = jax.block_until_ready(out)

    assert out.shape == (B, NUM_CLASSES)
    assert bool(jnp.all(jnp.isfinite(out)))
    print("KERNEL_OK")
</pallas_src>

<mosaic_0001>
module attributes {stable_mosaic.version = 11 : i64} {
  func.func @kernel(%arg0: memref<16x1xi32, #tpu.memory_space<vmem>>, %arg1: memref<100x32xf32, #tpu.memory_space<vmem>>, %arg2: memref<2x1x8xf32, #tpu.memory_space<vmem>>, %arg3: memref<4x8x8xf32, #tpu.memory_space<vmem>>, %arg4: memref<2x32x96xbf16, #tpu.memory_space<vmem>>, %arg5: memref<2x32x32xbf16, #tpu.memory_space<vmem>>, %arg6: memref<2x32x64xbf16, #tpu.memory_space<vmem>>, %arg7: memref<2x64x32xbf16, #tpu.memory_space<vmem>>, %arg8: memref<5x1x32xf32, #tpu.memory_space<vmem>>, %arg9: memref<33x128xf32, #tpu.memory_space<vmem>>, %arg10: memref<2x128xf32, #tpu.memory_space<vmem>>) attributes {dimension_semantics = [], scalar_prefetch = 0 : i64, scratch_operands = 0 : i64, tpu.core_type = #tpu.core_type<tc>} {
    %c0 = arith.constant 0 : index
    %c0_0 = arith.constant 0 : index
    %0 = vector.load %arg0[%c0, %c0_0] : memref<16x1xi32, #tpu.memory_space<vmem>>, vector<16x1xi32>
    %1 = tpu.iota {dimensions = array<i32: 1>} : vector<16x100xi32>
    %2 = vector.broadcast %0 : vector<16x1xi32> to vector<16x100xi32>
    %3 = arith.cmpi eq, %1, %2 : vector<16x100xi32>
    %4 = arith.extui %3 : vector<16x100xi1> to vector<16x100xi32>
    %5 = arith.sitofp %4 : vector<16x100xi32> to vector<16x100xf32>
    %c0_1 = arith.constant 0 : index
    %c0_2 = arith.constant 0 : index
    %6 = vector.load %arg1[%c0_1, %c0_2] : memref<100x32xf32, #tpu.memory_space<vmem>>, vector<100x32xf32>
    %cst = arith.constant dense<0.000000e+00> : vector<16x32xf32>
    %7 = tpu.matmul %5, %6, %cst {dimension_numbers = #tpu.dot_dimension_numbers<[1], [0], [0], [1], [0, 0, 1, 1], [], []>} : vector<16x100xf32>, vector<100x32xf32>, vector<16x32xf32> -> vector<16x32xf32>
    %c0_3 = arith.constant 0 : index
    %c0_4 = arith.constant 0 : index
    %c0_5 = arith.constant 0 : index
    %8 = vector.load %arg2[%c0_3, %c0_4, %c0_5] : memref<2x1x8xf32, #tpu.memory_space<vmem>>, vector<2x1x8xf32>
    %c0_6 = arith.constant 0 : index
    %c0_7 = arith.constant 0 : index
    %c0_8 = arith.constant 0 : index
    %9 = vector.load %arg3[%c0_6, %c0_7, %c0_8] : memref<4x8x8xf32, #tpu.memory_space<vmem>>, vector<1x8x8xf32>
    %10 = vector.shape_cast %9 : vector<1x8x8xf32> to vector<8x8xf32>
    %11 = vector.shape_cast %10 : vector<8x8xf32> to vector<1x8x8xf32>
    %12 = vector.broadcast %11 : vector<1x8x8xf32> to vector<2x8x8xf32>
    %13 = vector.broadcast %8 : vector<2x1x8xf32> to vector<2x8x8xf32>
    %14 = arith.addf %12, %13 : vector<2x8x8xf32>
    %c1 = arith.constant 1 : index
    %c0_9 = arith.constant 0 : index
    %c0_10 = arith.constant 0 : index
    %15 = vector.load %arg3[%c1, %c0_9, %c0_10] : memref<4x8x8xf32, #tpu.memory_space<vmem>>, vector<1x8x8xf32>
    %16 = vector.shape_cast %15 : vector<1x8x8xf32> to vector<8x8xf32>
    %17 = vector.shape_cast %16 : vector<8x8xf32> to vector<1x8x8xf32>
    %18 = vector.broadcast %17 : vector<1x8x8xf32> to vector<2x8x8xf32>
    %19 = vector.broadcast %8 : vector<2x1x8xf32> to vector<2x8x8xf32>
    %20 = arith.addf %18, %19 : vector<2x8x8xf32>
    %c2 = arith.constant 2 : index
    %c0_11 = arith.constant 0 : index
    %c0_12 = arith.constant 0 : index
    %21 = vector.load %arg3[%c2, %c0_11, %c0_12] : memref<4x8x8xf32, #tpu.memory_space<vmem>>, vector<1x8x8xf32>
    %22 = vector.shape_cast %21 : vector<1x8x8xf32> to vector<8x8xf32>
    %23 = vector.shape_cast %22 : vector<8x8xf32> to vector<1x8x8xf32>
    %24 = vector.broadcast %23 : vector<1x8x8xf32> to vector<2x8x8xf32>
    %25 = vector.broadcast %8 : vector<2x1x8xf32> to vector<2x8x8xf32>
    %26 = arith.addf %24, %25 : vector<2x8x8xf32>
    %c3 = arith.constant 3 : index
    %c0_13 = arith.constant 0 : index
    %c0_14 = arith.constant 0 : index
    %27 = vector.load %arg3[%c3, %c0_13, %c0_14] : memref<4x8x8xf32, #tpu.memory_space<vmem>>, vector<1x8x8xf32>
    %28 = vector.shape_cast %27 : vector<1x8x8xf32> to vector<8x8xf32>
    %29 = vector.shape_cast %28 : vector<8x8xf32> to vector<1x8x8xf32>
    %30 = vector.broadcast %29 : vector<1x8x8xf32> to vector<2x8x8xf32>
    %31 = vector.broadcast %8 : vector<2x1x8xf32> to vector<2x8x8xf32>
    %32 = arith.addf %30, %31 : vector<2x8x8xf32>
    %c0_15 = arith.constant 0 : index
    %c0_16 = arith.constant 0 : index
    %c0_17 = arith.constant 0 : index
    %33 = vector.load %arg8[%c0_15, %c0_16, %c0_17] : memref<5x1x32xf32, #tpu.memory_space<vmem>>, vector<1x1x32xf32>
    %34 = vector.shape_cast %33 : vector<1x1x32xf32> to vector<1x32xf32>
    %35 = arith.mulf %7, %7 : vector<16x32xf32>
    %cst_18 = arith.constant dense<0.000000e+00> : vector<16xf32>
    %36 = vector.multi_reduction <add>, %35, %cst_18 [1] : vector<16x32xf32> to vector<16xf32>
    %37 = vector.shape_cast %36 : vector<16xf32> to vector<16x1xf32>
    %cst_19 = arith.constant 3.200000e+01 : f32
    %38 = vector.broadcast %cst_19 : f32 to vector<16x1xf32>
    %39 = arith.divf %37, %38 : vector<16x1xf32>
    %cst_20 = arith.constant 9.99999997E-7 : f32
    %40 = vector.broadcast %cst_20 : f32 to vector<16x1xf32>
    %41 = arith.addf %39, %40 : vector<16x1xf32>
    %42 = math.rsqrt %41 : vector<16x1xf32>
    %43 = vector.broadcast %42 : vector<16x1xf32> to vector<16x32xf32>
    %44 = arith.mulf %7, %43 : vector<16x32xf32>
    %45 = vector.broadcast %34 : vector<1x32xf32> to vector<16x32xf32>
    %46 = arith.mulf %44, %45 : vector<16x32xf32>
    %47 = arith.truncf %46 : vector<16x32xf32> to vector<16x32xbf16>
    %c0_21 = arith.constant 0 : index
    %c0_22 = arith.constant 0 : index
    %c0_23 = arith.constant 0 : index
    %48 = vector.load %arg4[%c0_21, %c0_22, %c0_23] : memref<2x32x96xbf16, #tpu.memory_space<vmem>>, vector<1x32x96xbf16>
    %49 = vector.shape_cast %48 : vector<1x32x96xbf16> to vector<32x96xbf16>
    %cst_24 = arith.constant dense<0.000000e+00> : vector<16x96xf32>
    %50 = tpu.matmul %47, %49, %cst_24 {dimension_numbers = #tpu.dot_dimension_numbers<[1], [0], [0], [1], [0, 0, 1, 1], [], []>} : vector<16x32xbf16>, vector<32x96xbf16>, vector<16x96xf32> -> vector<16x96xf32>
    %51 = vector.extract_strided_slice %50 {offsets = [0, 0], sizes = [16, 8], strides = [1, 1]} : vector<16x96xf32> to vector<16x8xf32>
    %52 = arith.truncf %51 : vector<16x8xf32> to vector<16x8xbf16>
    %53 = vector.shape_cast %52 : vector<16x8xbf16> to vector<2x8x8xbf16>
    %54 = vector.extract_strided_slice %50 {offsets = [0, 32], sizes = [16, 8], strides = [1, 1]} : vector<16x96xf32> to vector<16x8xf32>
    %55 = arith.truncf %54 : vector<16x8xf32> to vector<16x8xbf16>
    %56 = vector.shape_cast %55 : vector<16x8xbf16> to vector<2x8x8xbf16>
    %57 = vector.extract_strided_slice %50 {offsets = [0, 64], sizes = [16, 8], strides = [1, 1]} : vector<16x96xf32> to vector<16x8xf32>
    %58 = arith.truncf %57 : vector<16x8xf32> to vector<16x8xbf16>
    %59 = vector.shape_cast %58 : vector<16x8xbf16> to vector<2x8x8xbf16>
    "tpu.trace_start"() <{level = 10 : i32, message = "bqd,bkd->bqk"}> : () -> ()
    %cst_25 = arith.constant dense<0.000000e+00> : vector<2x8x8xf32>
    %60 = tpu.matmul %53, %56, %cst_25 {dimension_numbers = #tpu.dot_dimension_numbers<[2], [2], [1], [1], [0, 0, 0, 1, 1, 1], [0], [0]>} : vector<2x8x8xbf16>, vector<2x8x8xbf16>, vector<2x8x8xf32> -> vector<2x8x8xf32>
    "tpu.trace_stop"() : () -> ()
    %61 = arith.addf %60, %14 : vector<2x8x8xf32>
    %cst_26 = arith.constant dense<0xFF800000> : vector<2x8xf32>
    %62 = vector.multi_reduction <maximumf>, %61, %cst_26 [2] : vector<2x8x8xf32> to vector<2x8xf32>
    %63 = vector.shape_cast %62 : vector<2x8xf32> to vector<2x8x1xf32>
    %64 = vector.broadcast %63 : vector<2x8x1xf32> to vector<2x8x8xf32>
    %65 = arith.subf %61, %64 : vector<2x8x8xf32>
    %66 = math.exp %65 : vector<2x8x8xf32>
    %cst_27 = arith.constant dense<0.000000e+00> : vector<2x8xf32>
    %67 = vector.multi_reduction <add>, %66, %cst_27 [2] : vector<2x8x8xf32> to vector<2x8xf32>
    %68 = vector.shape_cast %67 : vector<2x8xf32> to vector<2x8x1xf32>
    %69 = tpu.reciprocal %68 {approx = true} : vector<2x8x1xf32> -> vector<2x8x1xf32>
    %70 = vector.broadcast %69 : vector<2x8x1xf32> to vector<2x8x8xf32>
    %71 = arith.mulf %66, %70 : vector<2x8x8xf32>
    %72 = arith.truncf %71 : vector<2x8x8xf32> to vector<2x8x8xbf16>
    "tpu.trace_start"() <{level = 10 : i32, message = "bqk,bkd->bqd"}> : () -> ()
    %cst_28 = arith.constant dense<0.000000e+00> : vector<2x8x8xf32>
    %73 = tpu.matmul %72, %59, %cst_28 {dimension_numbers = #tpu.dot_dimension_numbers<[2], [1], [1], [2], [0, 0, 0, 1, 1, 2], [0], [0]>} : vector<2x8x8xbf16>, vector<2x8x8xbf16>, vector<2x8x8xf32> -> vector<2x8x8xf32>
    "tpu.trace_stop"() : () -> ()
    %74 = vector.shape_cast %73 : vector<2x8x8xf32> to vector<16x8xf32>
    %75 = vector.extract_strided_slice %50 {offsets = [0, 8], sizes = [16, 8], strides = [1, 1]} : vector<16x96xf32> to vector<16x8xf32>
    %76 = arith.truncf %75 : vector<16x8xf32> to vector<16x8xbf16>
    %77 = vector.shape_cast %76 : vector<16x8xbf16> to vector<2x8x8xbf16>
    %78 = vector.extract_strided_slice %50 {offsets = [0, 40], sizes = [16, 8], strides = [1, 1]} : vector<16x96xf32> to vector<16x8xf32>
    %79 = arith.truncf %78 : vector<16x8xf32> to vector<16x8xbf16>
    %80 = vector.shape_cast %79 : vector<16x8xbf16> to vector<2x8x8xbf16>
    %81 = vector.extract_strided_slice %50 {offsets = [0, 72], sizes = [16, 8], strides = [1, 1]} : vector<16x96xf32> to vector<16x8xf32>
    %82 = arith.truncf %81 : vector<16x8xf32> to vector<16x8xbf16>
    %83 = vector.shape_cast %82 : vector<16x8xbf16> to vector<2x8x8xbf16>
    "tpu.trace_start"() <{level = 10 : i32, message = "bqd,bkd->bqk"}> : () -> ()
    %cst_29 = arith.constant dense<0.000000e+00> : vector<2x8x8xf32>
    %84 = tpu.matmul %77, %80, %cst_29 {dimension_numbers = #tpu.dot_dimension_numbers<[2], [2], [1], [1], [0, 0, 0, 1, 1, 1], [0], [0]>} : vector<2x8x8xbf16>, vector<2x8x8xbf16>, vector<2x8x8xf32> -> vector<2x8x8xf32>
    "tpu.trace_stop"() : () -> ()
    %85 = arith.addf %84, %20 : vector<2x8x8xf32>
    %cst_30 = arith.constant dense<0xFF800000> : vector<2x8xf32>
    %86 = vector.multi_reduction <maximumf>, %85, %cst_30 [2] : vector<2x8x8xf32> to vector<2x8xf32>
    %87 = vector.shape_cast %86 : vector<2x8xf32> to vector<2x8x1xf32>
    %88 = vector.broadcast %87 : vector<2x8x1xf32> to vector<2x8x8xf32>
    %89 = arith.subf %85, %88 : vector<2x8x8xf32>
    %90 = math.exp %89 : vector<2x8x8xf32>
    %cst_31 = arith.constant dense<0.000000e+00> : vector<2x8xf32>
    %91 = vector.multi_reduction <add>, %90, %cst_31 [2] : vector<2x8x8xf32> to vector<2x8xf32>
    %92 = vector.shape_cast %91 : vector<2x8xf32> to vector<2x8x1xf32>
    %93 = tpu.reciprocal %92 {approx = true} : vector<2x8x1xf32> -> vector<2x8x1xf32>
    %94 = vector.broadcast %93 : vector<2x8x1xf32> to vector<2x8x8xf32>
    %95 = arith.mulf %90, %94 : vector<2x8x8xf32>
    %96 = arith.truncf %95 : vector<2x8x8xf32> to vector<2x8x8xbf16>
    "tpu.trace_start"() <{level = 10 : i32, message = "bqk,bkd->bqd"}> : () -> ()
    %cst_32 = arith.constant dense<0.000000e+00> : vector<2x8x8xf32>
    %97 = tpu.matmul %96, %83, %cst_32 {dimension_numbers = #tpu.dot_dimension_numbers<[2], [1], [1], [2], [0, 0, 0, 1, 1, 2], [0], [0]>} : vector<2x8x8xbf16>, vector<2x8x8xbf16>, vector<2x8x8xf32> -> vector<2x8x8xf32>
    "tpu.trace_stop"() : () -> ()
    %98 = vector.shape_cast %97 : vector<2x8x8xf32> to vector<16x8xf32>
    %99 = vector.extract_strided_slice %50 {offsets = [0, 16], sizes = [16, 8], strides = [1, 1]} : vector<16x96xf32> to vector<16x8xf32>
    %100 = arith.truncf %99 : vector<16x8xf32> to vector<16x8xbf16>
    %101 = vector.shape_cast %100 : vector<16x8xbf16> to vector<2x8x8xbf16>
    %102 = vector.extract_strided_slice %50 {offsets = [0, 48], sizes = [16, 8], strides = [1, 1]} : vector<16x96xf32> to vector<16x8xf32>
    %103 = arith.truncf %102 : vector<16x8xf32> to vector<16x8xbf16>
    %104 = vector.shape_cast %103 : vector<16x8xbf16> to vector<2x8x8xbf16>
    %105 = vector.extract_strided_slice %50 {offsets = [0, 80], sizes = [16, 8], strides = [1, 1]} : vector<16x96xf32> to vector<16x8xf32>
    %106 = arith.truncf %105 : vector<16x8xf32> to vector<16x8xbf16>
    %107 = vector.shape_cast %106 : vector<16x8xbf16> to vector<2x8x8xbf16>
    "tpu.trace_start"() <{level = 10 : i32, message = "bqd,bkd->bqk"}> : () -> ()
    %cst_33 = arith.constant dense<0.000000e+00> : vector<2x8x8xf32>
    %108 = tpu.matmul %101, %104, %cst_33 {dimension_numbers = #tpu.dot_dimension_numbers<[2], [2], [1], [1], [0, 0, 0, 1, 1, 1], [0], [0]>} : vector<2x8x8xbf16>, vector<2x8x8xbf16>, vector<2x8x8xf32> -> vector<2x8x8xf32>
    "tpu.trace_stop"() : () -> ()
    %109 = arith.addf %108, %26 : vector<2x8x8xf32>
    %cst_34 = arith.constant dense<0xFF800000> : vector<2x8xf32>
    %110 = vector.multi_reduction <maximumf>, %109, %cst_34 [2] : vector<2x8x8xf32> to vector<2x8xf32>
    %111 = vector.shape_cast %110 : vector<2x8xf32> to vector<2x8x1xf32>
    %112 = vector.broadcast %111 : vector<2x8x1xf32> to vector<2x8x8xf32>
    %113 = arith.subf %109, %112 : vector<2x8x8xf32>
    %114 = math.exp %113 : vector<2x8x8xf32>
    %cst_35 = arith.constant dense<0.000000e+00> : vector<2x8xf32>
    %115 = vector.multi_reduction <add>, %114, %cst_35 [2] : vector<2x8x8xf32> to vector<2x8xf32>
    %116 = vector.shape_cast %115 : vector<2x8xf32> to vector<2x8x1xf32>
    %117 = tpu.reciprocal %116 {approx = true} : vector<2x8x1xf32> -> vector<2x8x1xf32>
    %118 = vector.broadcast %117 : vector<2x8x1xf32> to vector<2x8x8xf32>
    %119 = arith.mulf %114, %118 : vector<2x8x8xf32>
    %120 = arith.truncf %119 : vector<2x8x8xf32> to vector<2x8x8xbf16>
    "tpu.trace_start"() <{level = 10 : i32, message = "bqk,bkd->bqd"}> : () -> ()
    %cst_36 = arith.constant dense<0.000000e+00> : vector<2x8x8xf32>
    %121 = tpu.matmul %120, %107, %cst_36 {dimension_numbers = #tpu.dot_dimension_numbers<[2], [1], [1], [2], [0, 0, 0, 1, 1, 2], [0], [0]>} : vector<2x8x8xbf16>, vector<2x8x8xbf16>, vector<2x8x8xf32> -> vector<2x8x8xf32>
    "tpu.trace_stop"() : () -> ()
    %122 = vector.shape_cast %121 : vector<2x8x8xf32> to vector<16x8xf32>
    %123 = vector.extract_strided_slice %50 {offsets = [0, 24], sizes = [16, 8], strides = [1, 1]} : vector<16x96xf32> to vector<16x8xf32>
    %124 = arith.truncf %123 : vector<16x8xf32> to vector<16x8xbf16>
    %125 = vector.shape_cast %124 : vector<16x8xbf16> to vector<2x8x8xbf16>
    %126 = vector.extract_strided_slice %50 {offsets = [0, 56], sizes = [16, 8], strides = [1, 1]} : vector<16x96xf32> to vector<16x8xf32>
    %127 = arith.truncf %126 : vector<16x8xf32> to vector<16x8xbf16>
    %128 = vector.shape_cast %127 : vector<16x8xbf16> to vector<2x8x8xbf16>
    %129 = vector.extract_strided_slice %50 {offsets = [0, 88], sizes = [16, 8], strides = [1, 1]} : vector<16x96xf32> to vector<16x8xf32>
    %130 = arith.truncf %129 : vector<16x8xf32> to vector<16x8xbf16>
    %131 = vector.shape_cast %130 : vector<16x8xbf16> to vector<2x8x8xbf16>
    "tpu.trace_start"() <{level = 10 : i32, message = "bqd,bkd->bqk"}> : () -> ()
    %cst_37 = arith.constant dense<0.000000e+00> : vector<2x8x8xf32>
    %132 = tpu.matmul %125, %128, %cst_37 {dimension_numbers = #tpu.dot_dimension_numbers<[2], [2], [1], [1], [0, 0, 0, 1, 1, 1], [0], [0]>} : vector<2x8x8xbf16>, vector<2x8x8xbf16>, vector<2x8x8xf32> -> vector<2x8x8xf32>
    "tpu.trace_stop"() : () -> ()
    %133 = arith.addf %132, %32 : vector<2x8x8xf32>
    %cst_38 = arith.constant dense<0xFF800000> : vector<2x8xf32>
    %134 = vector.multi_reduction <maximumf>, %133, %cst_38 [2] : vector<2x8x8xf32> to vector<2x8xf32>
    %135 = vector.shape_cast %134 : vector<2x8xf32> to vector<2x8x1xf32>
    %136 = vector.broadcast %135 : vector<2x8x1xf32> to vector<2x8x8xf32>
    %137 = arith.subf %133, %136 : vector<2x8x8xf32>
    %138 = math.exp %137 : vector<2x8x8xf32>
    %cst_39 = arith.constant dense<0.000000e+00> : vector<2x8xf32>
    %139 = vector.multi_reduction <add>, %138, %cst_39 [2] : vector<2x8x8xf32> to vector<2x8xf32>
    %140 = vector.shape_cast %139 : vector<2x8xf32> to vector<2x8x1xf32>
    %141 = tpu.reciprocal %140 {approx = true} : vector<2x8x1xf32> -> vector<2x8x1xf32>
    %142 = vector.broadcast %141 : vector<2x8x1xf32> to vector<2x8x8xf32>
    %143 = arith.mulf %138, %142 : vector<2x8x8xf32>
    %144 = arith.truncf %143 : vector<2x8x8xf32> to vector<2x8x8xbf16>
    "tpu.trace_start"() <{level = 10 : i32, message = "bqk,bkd->bqd"}> : () -> ()
    %cst_40 = arith.constant dense<0.000000e+00> : vector<2x8x8xf32>
    %145 = tpu.matmul %144, %131, %cst_40 {dimension_numbers = #tpu.dot_dimension_numbers<[2], [1], [1], [2], [0, 0, 0, 1, 1, 2], [0], [0]>} : vector<2x8x8xbf16>, vector<2x8x8xbf16>, vector<2x8x8xf32> -> vector<2x8x8xf32>
    "tpu.trace_stop"() : () -> ()
    %146 = vector.shape_cast %145 : vector<2x8x8xf32> to vector<16x8xf32>
    %147 = tpu.concatenate %74, %98, %122, %146 in 1 : vector<16x8xf32>, vector<16x8xf32>, vector<16x8xf32>, vector<16x8xf32> -> vector<16x32xf32>
    %148 = arith.truncf %147 : vector<16x32xf32> to vector<16x32xbf16>
    %c0_41 = arith.constant 0 : index
    %c0_42 = arith.constant 0 : index
    %c0_43 = arith.constant 0 : index
    %149 = vector.load %arg5[%c0_41, %c0_42, %c0_43] : memref<2x32x32xbf16, #tpu.memory_space<vmem>>, vector<1x32x32xbf16>
    %150 = vector.shape_cast %149 : vector<1x32x32xbf16> to vector<32x32xbf16>
    %cst_44 = arith.constant dense<0.000000e+00> : vector<16x32xf32>
    %151 = tpu.matmul %148, %150, %cst_44 {dimension_numbers = #tpu.dot_dimension_numbers<[1], [0], [0], [1], [0, 0, 1, 1], [], []>} : vector<16x32xbf16>, vector<32x32xbf16>, vector<16x32xf32> -> vector<16x32xf32>
    %152 = arith.addf %7, %151 : vector<16x32xf32>
    %c1_45 = arith.constant 1 : index
    %c0_46 = arith.constant 0 : index
    %c0_47 = arith.constant 0 : index
    %153 = vector.load %arg8[%c1_45, %c0_46, %c0_47] : memref<5x1x32xf32, #tpu.memory_space<vmem>>, vector<1x1x32xf32>
    %154 = vector.shape_cast %153 : vector<1x1x32xf32> to vector<1x32xf32>
    %155 = arith.mulf %152, %152 : vector<16x32xf32>
    %cst_48 = arith.constant dense<0.000000e+00> : vector<16xf32>
    %156 = vector.multi_reduction <add>, %155, %cst_48 [1] : vector<16x32xf32> to vector<16xf32>
    %157 = vector.shape_cast %156 : vector<16xf32> to vector<16x1xf32>
    %cst_49 = arith.constant 3.200000e+01 : f32
    %158 = vector.broadcast %cst_49 : f32 to vector<16x1xf32>
    %159 = arith.divf %157, %158 : vector<16x1xf32>
    %cst_50 = arith.constant 9.99999997E-7 : f32
    %160 = vector.broadcast %cst_50 : f32 to vector<16x1xf32>
    %161 = arith.addf %159, %160 : vector<16x1xf32>
    %162 = math.rsqrt %161 : vector<16x1xf32>
    %163 = vector.broadcast %162 : vector<16x1xf32> to vector<16x32xf32>
    %164 = arith.mulf %152, %163 : vector<16x32xf32>
    %165 = vector.broadcast %154 : vector<1x32xf32> to vector<16x32xf32>
    %166 = arith.mulf %164, %165 : vector<16x32xf32>
    %167 = arith.truncf %166 : vector<16x32xf32> to vector<16x32xbf16>
    %c0_51 = arith.constant 0 : index
    %c0_52 = arith.constant 0 : index
    %c0_53 = arith.constant 0 : index
    %168 = vector.load %arg6[%c0_51, %c0_52, %c0_53] : memref<2x32x64xbf16, #tpu.memory_space<vmem>>, vector<1x32x64xbf16>
    %169 = vector.shape_cast %168 : vector<1x32x64xbf16> to vector<32x64xbf16>
    %cst_54 = arith.constant dense<0.000000e+00> : vector<16x64xf32>
    %170 = tpu.matmul %167, %169, %cst_54 {dimension_numbers = #tpu.dot_dimension_numbers<[1], [0], [0], [1], [0, 0, 1, 1], [], []>} : vector<16x32xbf16>, vector<32x64xbf16>, vector<16x64xf32> -> vector<16x64xf32>
    %cst_55 = arith.constant 0.000000e+00 : f32
    %171 = vector.broadcast %cst_55 : f32 to vector<16x64xf32>
    %172 = arith.maximumf %170, %171 : vector<16x64xf32>
    %173 = arith.truncf %172 : vector<16x64xf32> to vector<16x64xbf16>
    %c0_56 = arith.constant 0 : index
    %c0_57 = arith.constant 0 : index
    %c0_58 = arith.constant 0 : index
    %174 = vector.load %arg7[%c0_56, %c0_57, %c0_58] : memref<2x64x32xbf16, #tpu.memory_space<vmem>>, vector<1x64x32xbf16>
    %175 = vector.shape_cast %174 : vector<1x64x32xbf16> to vector<64x32xbf16>
    %cst_59 = arith.constant dense<0.000000e+00> : vector<16x32xf32>
    %176 = tpu.matmul %173, %175, %cst_59 {dimension_numbers = #tpu.dot_dimension_numbers<[1], [0], [0], [1], [0, 0, 1, 1], [], []>} : vector<16x64xbf16>, vector<64x32xbf16>, vector<16x32xf32> -> vector<16x32xf32>
    %177 = arith.addf %152, %176 : vector<16x32xf32>
    %c2_60 = arith.constant 2 : index
    %c0_61 = arith.constant 0 : index
    %c0_62 = arith.constant 0 : index
    %178 = vector.load %arg8[%c2_60, %c0_61, %c0_62] : memref<5x1x32xf32, #tpu.memory_space<vmem>>, vector<1x1x32xf32>
    %179 = vector.shape_cast %178 : vector<1x1x32xf32> to vector<1x32xf32>
    %180 = arith.mulf %177, %177 : vector<16x32xf32>
    %cst_63 = arith.constant dense<0.000000e+00> : vector<16xf32>
    %181 = vector.multi_reduction <add>, %180, %cst_63 [1] : vector<16x32xf32> to vector<16xf32>
    %182 = vector.shape_cast %181 : vector<16xf32> to vector<16x1xf32>
    %cst_64 = arith.constant 3.200000e+01 : f32
    %183 = vector.broadcast %cst_64 : f32 to vector<16x1xf32>
    %184 = arith.divf %182, %183 : vector<16x1xf32>
    %cst_65 = arith.constant 9.99999997E-7 : f32
    %185 = vector.broadcast %cst_65 : f32 to vector<16x1xf32>
    %186 = arith.addf %184, %185 : vector<16x1xf32>
    %187 = math.rsqrt %186 : vector<16x1xf32>
    %188 = vector.broadcast %187 : vector<16x1xf32> to vector<16x32xf32>
    %189 = arith.mulf %177, %188 : vector<16x32xf32>
    %190 = vector.broadcast %179 : vector<1x32xf32> to vector<16x32xf32>
    %191 = arith.mulf %189, %190 : vector<16x32xf32>
    %192 = arith.truncf %191 : vector<16x32xf32> to vector<16x32xbf16>
    %c1_66 = arith.constant 1 : index
    %c0_67 = arith.constant 0 : index
    %c0_68 = arith.constant 0 : index
    %193 = vector.load %arg4[%c1_66, %c0_67, %c0_68] : memref<2x32x96xbf16, #tpu.memory_space<vmem>>, vector<1x32x96xbf16>
    %194 = vector.shape_cast %193 : vector<1x32x96xbf16> to vector<32x96xbf16>
    %cst_69 = arith.constant dense<0.000000e+00> : vector<16x96xf32>
    %195 = tpu.matmul %192, %194, %cst_69 {dimension_numbers = #tpu.dot_dimension_numbers<[1], [0], [0], [1], [0, 0, 1, 1], [], []>} : vector<16x32xbf16>, vector<32x96xbf16>, vector<16x96xf32> -> vector<16x96xf32>
    %196 = vector.extract_strided_slice %195 {offsets = [0, 0], sizes = [16, 8], strides = [1, 1]} : vector<16x96xf32> to vector<16x8xf32>
    %197 = arith.truncf %196 : vector<16x8xf32> to vector<16x8xbf16>
    %198 = vector.shape_cast %197 : vector<16x8xbf16> to vector<2x8x8xbf16>
    %199 = vector.extract_strided_slice %195 {offsets = [0, 32], sizes = [16, 8], strides = [1, 1]} : vector<16x96xf32> to vector<16x8xf32>
    %200 = arith.truncf %199 : vector<16x8xf32> to vector<16x8xbf16>
    %201 = vector.shape_cast %200 : vector<16x8xbf16> to vector<2x8x8xbf16>
    %202 = vector.extract_strided_slice %195 {offsets = [0, 64], sizes = [16, 8], strides = [1, 1]} : vector<16x96xf32> to vector<16x8xf32>
    %203 = arith.truncf %202 : vector<16x8xf32> to vector<16x8xbf16>
    %204 = vector.shape_cast %203 : vector<16x8xbf16> to vector<2x8x8xbf16>
    "tpu.trace_start"() <{level = 10 : i32, message = "bqd,bkd->bqk"}> : () -> ()
    %cst_70 = arith.constant dense<0.000000e+00> : vector<2x8x8xf32>
    %205 = tpu.matmul %198, %201, %cst_70 {dimension_numbers = #tpu.dot_dimension_numbers<[2], [2], [1], [1], [0, 0, 0, 1, 1, 1], [0], [0]>} : vector<2x8x8xbf16>, vector<2x8x8xbf16>, vector<2x8x8xf32> -> vector<2x8x8xf32>
    "tpu.trace_stop"() : () -> ()
    %206 = arith.addf %205, %14 : vector<2x8x8xf32>
    %cst_71 = arith.constant dense<0xFF800000> : vector<2x8xf32>
    %207 = vector.multi_reduction <maximumf>, %206, %cst_71 [2] : vector<2x8x8xf32> to vector<2x8xf32>
    %208 = vector.shape_cast %207 : vector<2x8xf32> to vector<2x8x1xf32>
    %209 = vector.broadcast %208 : vector<2x8x1xf32> to vector<2x8x8xf32>
    %210 = arith.subf %206, %209 : vector<2x8x8xf32>
    %211 = math.exp %210 : vector<2x8x8xf32>
    %cst_72 = arith.constant dense<0.000000e+00> : vector<2x8xf32>
    %212 = vector.multi_reduction <add>, %211, %cst_72 [2] : vector<2x8x8xf32> to vector<2x8xf32>
    %213 = vector.shape_cast %212 : vector<2x8xf32> to vector<2x8x1xf32>
    %214 = tpu.reciprocal %213 {approx = true} : vector<2x8x1xf32> -> vector<2x8x1xf32>
    %215 = vector.broadcast %214 : vector<2x8x1xf32> to vector<2x8x8xf32>
    %216 = arith.mulf %211, %215 : vector<2x8x8xf32>
    %217 = arith.truncf %216 : vector<2x8x8xf32> to vector<2x8x8xbf16>
    "tpu.trace_start"() <{level = 10 : i32, message = "bqk,bkd->bqd"}> : () -> ()
    %cst_73 = arith.constant dense<0.000000e+00> : vector<2x8x8xf32>
    %218 = tpu.matmul %217, %204, %cst_73 {dimension_numbers = #tpu.dot_dimension_numbers<[2], [1], [1], [2], [0, 0, 0, 1, 1, 2], [0], [0]>} : vector<2x8x8xbf16>, vector<2x8x8xbf16>, vector<2x8x8xf32> -> vector<2x8x8xf32>
    "tpu.trace_stop"() : () -> ()
    %219 = vector.shape_cast %218 : vector<2x8x8xf32> to vector<16x8xf32>
    %220 = vector.extract_strided_slice %195 {offsets = [0, 8], sizes = [16, 8], strides = [1, 1]} : vector<16x96xf32> to vector<16x8xf32>
    %221 = arith.truncf %220 : vector<16x8xf32> to vector<16x8xbf16>
    %222 = vector.shape_cast %221 : vector<16x8xbf16> to vector<2x8x8xbf16>
    %223 = vector.extract_strided_slice %195 {offsets = [0, 40], sizes = [16, 8], strides = [1, 1]} : vector<16x96xf32> to vector<16x8xf32>
    %224 = arith.truncf %223 : vector<16x8xf32> to vector<16x8xbf16>
    %225 = vector.shape_cast %224 : vector<16x8xbf16> to vector<2x8x8xbf16>
    %226 = vector.extract_strided_slice %195 {offsets = [0, 72], sizes = [16, 8], strides = [1, 1]} : vector<16x96xf32> to vector<16x8xf32>
    %227 = arith.truncf %226 : vector<16x8xf32> to vector<16x8xbf16>
    %228 = vector.shape_cast %227 : vector<16x8xbf16> to vector<2x8x8xbf16>
    "tpu.trace_start"() <{level = 10 : i32, message = "bqd,bkd->bqk"}> : () -> ()
    %cst_74 = arith.constant dense<0.000000e+00> : vector<2x8x8xf32>
    %229 = tpu.matmul %222, %225, %cst_74 {dimension_numbers = #tpu.dot_dimension_numbers<[2], [2], [1], [1], [0, 0, 0, 1, 1, 1], [0], [0]>} : vector<2x8x8xbf16>, vector<2x8x8xbf16>, vector<2x8x8xf32> -> vector<2x8x8xf32>
    "tpu.trace_stop"() : () -> ()
    %230 = arith.addf %229, %20 : vector<2x8x8xf32>
    %cst_75 = arith.constant dense<0xFF800000> : vector<2x8xf32>
    %231 = vector.multi_reduction <maximumf>, %230, %cst_75 [2] : vector<2x8x8xf32> to vector<2x8xf32>
    %232 = vector.shape_cast %231 : vector<2x8xf32> to vector<2x8x1xf32>
    %233 = vector.broadcast %232 : vector<2x8x1xf32> to vector<2x8x8xf32>
    %234 = arith.subf %230, %233 : vector<2x8x8xf32>
    %235 = math.exp %234 : vector<2x8x8xf32>
    %cst_76 = arith.constant dense<0.000000e+00> : vector<2x8xf32>
    %236 = vector.multi_reduction <add>, %235, %cst_76 [2] : vector<2x8x8xf32> to vector<2x8xf32>
    %237 = vector.shape_cast %236 : vector<2x8xf32> to vector<2x8x1xf32>
    %238 = tpu.reciprocal %237 {approx = true} : vector<2x8x1xf32> -> vector<2x8x1xf32>
    %239 = vector.broadcast %238 : vector<2x8x1xf32> to vector<2x8x8xf32>
    %240 = arith.mulf %235, %239 : vector<2x8x8xf32>
    %241 = arith.truncf %240 : vector<2x8x8xf32> to vector<2x8x8xbf16>
    "tpu.trace_start"() <{level = 10 : i32, message = "bqk,bkd->bqd"}> : () -> ()
    %cst_77 = arith.constant dense<0.000000e+00> : vector<2x8x8xf32>
    %242 = tpu.matmul %241, %228, %cst_77 {dimension_numbers = #tpu.dot_dimension_numbers<[2], [1], [1], [2], [0, 0, 0, 1, 1, 2], [0], [0]>} : vector<2x8x8xbf16>, vector<2x8x8xbf16>, vector<2x8x8xf32> -> vector<2x8x8xf32>
    "tpu.trace_stop"() : () -> ()
    %243 = vector.shape_cast %242 : vector<2x8x8xf32> to vector<16x8xf32>
    %244 = vector.extract_strided_slice %195 {offsets = [0, 16], sizes = [16, 8], strides = [1, 1]} : vector<16x96xf32> to vector<16x8xf32>
    %245 = arith.truncf %244 : vector<16x8xf32> to vector<16x8xbf16>
    %246 = vector.shape_cast %245 : vector<16x8xbf16> to vector<2x8x8xbf16>
    %247 = vector.extract_strided_slice %195 {offsets = [0, 48], sizes = [16, 8], strides = [1, 1]} : vector<16x96xf32> to vector<16x8xf32>
    %248 = arith.truncf %247 : vector<16x8xf32> to vector<16x8xbf16>
    %249 = vector.shape_cast %248 : vector<16x8xbf16> to vector<2x8x8xbf16>
    %250 = vector.extract_strided_slice %195 {offsets = [0, 80], sizes = [16, 8], strides = [1, 1]} : vector<16x96xf32> to vector<16x8xf32>
    %251 = arith.truncf %250 : vector<16x8xf32> to vector<16x8xbf16>
    %252 = vector.shape_cast %251 : vector<16x8xbf16> to vector<2x8x8xbf16>
    "tpu.trace_start"() <{level = 10 : i32, message = "bqd,bkd->bqk"}> : () -> ()
    %cst_78 = arith.constant dense<0.000000e+00> : vector<2x8x8xf32>
    %253 = tpu.matmul %246, %249, %cst_78 {dimension_numbers = #tpu.dot_dimension_numbers<[2], [2], [1], [1], [0, 0, 0, 1, 1, 1], [0], [0]>} : vector<2x8x8xbf16>, vector<2x8x8xbf16>, vector<2x8x8xf32> -> vector<2x8x8xf32>
    "tpu.trace_stop"() : () -> ()
    %254 = arith.addf %253, %26 : vector<2x8x8xf32>
    %cst_79 = arith.constant dense<0xFF800000> : vector<2x8xf32>
    %255 = vector.multi_reduction <maximumf>, %254, %cst_79 [2] : vector<2x8x8xf32> to vector<2x8xf32>
    %256 = vector.shape_cast %255 : vector<2x8xf32> to vector<2x8x1xf32>
    %257 = vector.broadcast %256 : vector<2x8x1xf32> to vector<2x8x8xf32>
    %258 = arith.subf %254, %257 : vector<2x8x8xf32>
    %259 = math.exp %258 : vector<2x8x8xf32>
    %cst_80 = arith.constant dense<0.000000e+00> : vector<2x8xf32>
    %260 = vector.multi_reduction <add>, %259, %cst_80 [2] : vector<2x8x8xf32> to vector<2x8xf32>
    %261 = vector.shape_cast %260 : vector<2x8xf32> to vector<2x8x1xf32>
    %262 = tpu.reciprocal %261 {approx = true} : vector<2x8x1xf32> -> vector<2x8x1xf32>
    %263 = vector.broadcast %262 : vector<2x8x1xf32> to vector<2x8x8xf32>
    %264 = arith.mulf %259, %263 : vector<2x8x8xf32>
    %265 = arith.truncf %264 : vector<2x8x8xf32> to vector<2x8x8xbf16>
    "tpu.trace_start"() <{level = 10 : i32, message = "bqk,bkd->bqd"}> : () -> ()
    %cst_81 = arith.constant dense<0.000000e+00> : vector<2x8x8xf32>
    %266 = tpu.matmul %265, %252, %cst_81 {dimension_numbers = #tpu.dot_dimension_numbers<[2], [1], [1], [2], [0, 0, 0, 1, 1, 2], [0], [0]>} : vector<2x8x8xbf16>, vector<2x8x8xbf16>, vector<2x8x8xf32> -> vector<2x8x8xf32>
    "tpu.trace_stop"() : () -> ()
    %267 = vector.shape_cast %266 : vector<2x8x8xf32> to vector<16x8xf32>
    %268 = vector.extract_strided_slice %195 {offsets = [0, 24], sizes = [16, 8], strides = [1, 1]} : vector<16x96xf32> to vector<16x8xf32>
    %269 = arith.truncf %268 : vector<16x8xf32> to vector<16x8xbf16>
    %270 = vector.shape_cast %269 : vector<16x8xbf16> to vector<2x8x8xbf16>
    %271 = vector.extract_strided_slice %195 {offsets = [0, 56], sizes = [16, 8], strides = [1, 1]} : vector<16x96xf32> to vector<16x8xf32>
    %272 = arith.truncf %271 : vector<16x8xf32> to vector<16x8xbf16>
    %273 = vector.shape_cast %272 : vector<16x8xbf16> to vector<2x8x8xbf16>
    %274 = vector.extract_strided_slice %195 {offsets = [0, 88], sizes = [16, 8], strides = [1, 1]} : vector<16x96xf32> to vector<16x8xf32>
    %275 = arith.truncf %274 : vector<16x8xf32> to vector<16x8xbf16>
    %276 = vector.shape_cast %275 : vector<16x8xbf16> to vector<2x8x8xbf16>
    "tpu.trace_start"() <{level = 10 : i32, message = "bqd,bkd->bqk"}> : () -> ()
    %cst_82 = arith.constant dense<0.000000e+00> : vector<2x8x8xf32>
    %277 = tpu.matmul %270, %273, %cst_82 {dimension_numbers = #tpu.dot_dimension_numbers<[2], [2], [1], [1], [0, 0, 0, 1, 1, 1], [0], [0]>} : vector<2x8x8xbf16>, vector<2x8x8xbf16>, vector<2x8x8xf32> -> vector<2x8x8xf32>
    "tpu.trace_stop"() : () -> ()
    %278 = arith.addf %277, %32 : vector<2x8x8xf32>
    %cst_83 = arith.constant dense<0xFF800000> : vector<2x8xf32>
    %279 = vector.multi_reduction <maximumf>, %278, %cst_83 [2] : vector<2x8x8xf32> to vector<2x8xf32>
    %280 = vector.shape_cast %279 : vector<2x8xf32> to vector<2x8x1xf32>
    %281 = vector.broadcast %280 : vector<2x8x1xf32> to vector<2x8x8xf32>
    %282 = arith.subf %278, %281 : vector<2x8x8xf32>
    %283 = math.exp %282 : vector<2x8x8xf32>
    %cst_84 = arith.constant dense<0.000000e+00> : vector<2x8xf32>
    %284 = vector.multi_reduction <add>, %283, %cst_84 [2] : vector<2x8x8xf32> to vector<2x8xf32>
    %285 = vector.shape_cast %284 : vector<2x8xf32> to vector<2x8x1xf32>
    %286 = tpu.reciprocal %285 {approx = true} : vector<2x8x1xf32> -> vector<2x8x1xf32>
    %287 = vector.broadcast %286 : vector<2x8x1xf32> to vector<2x8x8xf32>
    %288 = arith.mulf %283, %287 : vector<2x8x8xf32>
    %289 = arith.truncf %288 : vector<2x8x8xf32> to vector<2x8x8xbf16>
    "tpu.trace_start"() <{level = 10 : i32, message = "bqk,bkd->bqd"}> : () -> ()
    %cst_85 = arith.constant dense<0.000000e+00> : vector<2x8x8xf32>
    %290 = tpu.matmul %289, %276, %cst_85 {dimension_numbers = #tpu.dot_dimension_numbers<[2], [1], [1], [2], [0, 0, 0, 1, 1, 2], [0], [0]>} : vector<2x8x8xbf16>, vector<2x8x8xbf16>, vector<2x8x8xf32> -> vector<2x8x8xf32>
    "tpu.trace_stop"() : () -> ()
    %291 = vector.shape_cast %290 : vector<2x8x8xf32> to vector<16x8xf32>
    %292 = tpu.concatenate %219, %243, %267, %291 in 1 : vector<16x8xf32>, vector<16x8xf32>, vector<16x8xf32>, vector<16x8xf32> -> vector<16x32xf32>
    %293 = arith.truncf %292 : vector<16x32xf32> to vector<16x32xbf16>
    %c1_86 = arith.constant 1 : index
    %c0_87 = arith.constant 0 : index
    %c0_88 = arith.constant 0 : index
    %294 = vector.load %arg5[%c1_86, %c0_87, %c0_88] : memref<2x32x32xbf16, #tpu.memory_space<vmem>>, vector<1x32x32xbf16>
    %295 = vector.shape_cast %294 : vector<1x32x32xbf16> to vector<32x32xbf16>
    %cst_89 = arith.constant dense<0.000000e+00> : vector<16x32xf32>
    %296 = tpu.matmul %293, %295, %cst_89 {dimension_numbers = #tpu.dot_dimension_numbers<[1], [0], [0], [1], [0, 0, 1, 1], [], []>} : vector<16x32xbf16>, vector<32x32xbf16>, vector<16x32xf32> -> vector<16x32xf32>
    %297 = arith.addf %177, %296 : vector<16x32xf32>
    %c3_90 = arith.constant 3 : index
    %c0_91 = arith.constant 0 : index
    %c0_92 = arith.constant 0 : index
    %298 = vector.load %arg8[%c3_90, %c0_91, %c0_92] : memref<5x1x32xf32, #tpu.memory_space<vmem>>, vector<1x1x32xf32>
    %299 = vector.shape_cast %298 : vector<1x1x32xf32> to vector<1x32xf32>
    %300 = arith.mulf %297, %297 : vector<16x32xf32>
    %cst_93 = arith.constant dense<0.000000e+00> : vector<16xf32>
    %301 = vector.multi_reduction <add>, %300, %cst_93 [1] : vector<16x32xf32> to vector<16xf32>
    %302 = vector.shape_cast %301 : vector<16xf32> to vector<16x1xf32>
    %cst_94 = arith.constant 3.200000e+01 : f32
    %303 = vector.broadcast %cst_94 : f32 to vector<16x1xf32>
    %304 = arith.divf %302, %303 : vector<16x1xf32>
    %cst_95 = arith.constant 9.99999997E-7 : f32
    %305 = vector.broadcast %cst_95 : f32 to vector<16x1xf32>
    %306 = arith.addf %304, %305 : vector<16x1xf32>
    %307 = math.rsqrt %306 : vector<16x1xf32>
    %308 = vector.broadcast %307 : vector<16x1xf32> to vector<16x32xf32>
    %309 = arith.mulf %297, %308 : vector<16x32xf32>
    %310 = vector.broadcast %299 : vector<1x32xf32> to vector<16x32xf32>
    %311 = arith.mulf %309, %310 : vector<16x32xf32>
    %312 = arith.truncf %311 : vector<16x32xf32> to vector<16x32xbf16>
    %c1_96 = arith.constant 1 : index
    %c0_97 = arith.constant 0 : index
    %c0_98 = arith.constant 0 : index
    %313 = vector.load %arg6[%c1_96, %c0_97, %c0_98] : memref<2x32x64xbf16, #tpu.memory_space<vmem>>, vector<1x32x64xbf16>
    %314 = vector.shape_cast %313 : vector<1x32x64xbf16> to vector<32x64xbf16>
    %cst_99 = arith.constant dense<0.000000e+00> : vector<16x64xf32>
    %315 = tpu.matmul %312, %314, %cst_99 {dimension_numbers = #tpu.dot_dimension_numbers<[1], [0], [0], [1], [0, 0, 1, 1], [], []>} : vector<16x32xbf16>, vector<32x64xbf16>, vector<16x64xf32> -> vector<16x64xf32>
    %cst_100 = arith.constant 0.000000e+00 : f32
    %316 = vector.broadcast %cst_100 : f32 to vector<16x64xf32>
    %317 = arith.maximumf %315, %316 : vector<16x64xf32>
    %318 = arith.truncf %317 : vector<16x64xf32> to vector<16x64xbf16>
    %c1_101 = arith.constant 1 : index
    %c0_102 = arith.constant 0 : index
    %c0_103 = arith.constant 0 : index
    %319 = vector.load %arg7[%c1_101, %c0_102, %c0_103] : memref<2x64x32xbf16, #tpu.memory_space<vmem>>, vector<1x64x32xbf16>
    %320 = vector.shape_cast %319 : vector<1x64x32xbf16> to vector<64x32xbf16>
    %cst_104 = arith.constant dense<0.000000e+00> : vector<16x32xf32>
    %321 = tpu.matmul %318, %320, %cst_104 {dimension_numbers = #tpu.dot_dimension_numbers<[1], [0], [0], [1], [0, 0, 1, 1], [], []>} : vector<16x64xbf16>, vector<64x32xbf16>, vector<16x32xf32> -> vector<16x32xf32>
    %322 = arith.addf %297, %321 : vector<16x32xf32>
    %c4 = arith.constant 4 : index
    %c0_105 = arith.constant 0 : index
    %c0_106 = arith.constant 0 : index
    %323 = vector.load %arg8[%c4, %c0_105, %c0_106] : memref<5x1x32xf32, #tpu.memory_space<vmem>>, vector<1x1x32xf32>
    %324 = vector.shape_cast %323 : vector<1x1x32xf32> to vector<1x32xf32>
    %325 = arith.mulf %322, %322 : vector<16x32xf32>
    %cst_107 = arith.constant dense<0.000000e+00> : vector<16xf32>
    %326 = vector.multi_reduction <add>, %325, %cst_107 [1] : vector<16x32xf32> to vector<16xf32>
    %327 = vector.shape_cast %326 : vector<16xf32> to vector<16x1xf32>
    %cst_108 = arith.constant 3.200000e+01 : f32
    %328 = vector.broadcast %cst_108 : f32 to vector<16x1xf32>
    %329 = arith.divf %327, %328 : vector<16x1xf32>
    %cst_109 = arith.constant 9.99999997E-7 : f32
    %330 = vector.broadcast %cst_109 : f32 to vector<16x1xf32>
    %331 = arith.addf %329, %330 : vector<16x1xf32>
    %332 = math.rsqrt %331 : vector<16x1xf32>
    %333 = vector.broadcast %332 : vector<16x1xf32> to vector<16x32xf32>
    %334 = arith.mulf %322, %333 : vector<16x32xf32>
    %335 = vector.broadcast %324 : vector<1x32xf32> to vector<16x32xf32>
    %336 = arith.mulf %334, %335 : vector<16x32xf32>
    %337 = tpu.iota {dimensions = array<i32: 0>} : vector<2x16xi32>
    %338 = tpu.iota {dimensions = array<i32: 1>} : vector<2x16xi32>
    %c8_i32 = arith.constant 8 : i32
    %339 = vector.broadcast %c8_i32 : i32 to vector<2x16xi32>
    %340 = arith.muli %337, %339 : vector<2x16xi32>
    %341 = arith.cmpi eq, %338, %340 : vector<2x16xi32>
    %342 = arith.extui %341 : vector<2x16xi1> to vector<2x16xi32>
    %343 = arith.sitofp %342 : vector<2x16xi32> to vector<2x16xf32>
    %cst_110 = arith.constant dense<0.000000e+00> : vector<2x32xf32>
    %344 = tpu.matmul %343, %336, %cst_110 {dimension_numbers = #tpu.dot_dimension_numbers<[1], [0], [0], [1], [0, 0, 1, 1], [], []>} : vector<2x16xf32>, vector<16x32xf32>, vector<2x32xf32> -> vector<2x32xf32>
    %c0_111 = arith.constant 0 : index
    %c0_112 = arith.constant 0 : index
    %345 = vector.load %arg9[%c0_111, %c0_112] : memref<33x128xf32, #tpu.memory_space<vmem>>, vector<32x128xf32>
    %cst_113 = arith.constant dense<0.000000e+00> : vector<2x128xf32>
    %346 = tpu.matmul %344, %345, %cst_113 {dimension_numbers = #tpu.dot_dimension_numbers<[1], [0], [0], [1], [0, 0, 1, 1], [], []>} : vector<2x32xf32>, vector<32x128xf32>, vector<2x128xf32> -> vector<2x128xf32>
    %c32 = arith.constant 32 : index
    %c0_114 = arith.constant 0 : index
    %347 = vector.load %arg9[%c32, %c0_114] : memref<33x128xf32, #tpu.memory_space<vmem>>, vector<1x128xf32>
    %348 = vector.broadcast %347 : vector<1x128xf32> to vector<2x128xf32>
    %349 = arith.addf %346, %348 : vector<2x128xf32>
    %c0_115 = arith.constant 0 : index
    %c0_116 = arith.constant 0 : index
    %350 = vector.load %arg10[%c0_115, %c0_116] : memref<2x128xf32, #tpu.memory_space<vmem>>, vector<2x128xf32>
    tpu.vector_store %arg10[%c0_115, %c0_116], %349 {strides = array<i32>} : memref<2x128xf32, #tpu.memory_space<vmem>>, vector<2x128xf32>,
    return
  }
}

</mosaic_0001>

<bundles_post_ra>
// kernel: model_forward.1
= control target key start
LH: loop header
LB: loop body
LE: loop exit
PB: predicated region body
PF: predicated region fallthrough
CT: control target
= control target key end

     0   :  { %vm73_vm0 = vcmask 1043456   ;;  %v2042_v2 = vmov 0   ;;  %s2655_s0 = inlined_call_operand.vmem [shape: s32[16,1], index: 0, kind: input, shape index: {}]   ;;  %s2656_s1 = inlined_call_operand.vmem [shape: f32[100,32], index: 1, kind: input, shape index: {}]   ;;  %s2657_s2 = inlined_call_operand.vmem [shape: f32[2,1,8], index: 2, kind: input, shape index: {}]   ;;  %s2658_s3 = inlined_call_operand.vmem [shape: f32[4,8,8], index: 3, kind: input, shape index: {}]   ;;  %s2659_s4 = inlined_call_operand.vmem [shape: bf16[2,32,96], index: 4, kind: input, shape index: {}]   ;;  %s2660_s5 = inlined_call_operand.vmem [shape: bf16[2,32,32], index: 5, kind: input, shape index: {}]   ;;  %s2661_s6 = inlined_call_operand.vmem [shape: bf16[2,32,64], index: 6, kind: input, shape index: {}]   ;;  %s2662_s7 = inlined_call_operand.vmem [shape: bf16[2,64,32], index: 7, kind: input, shape index: {}]   ;;  %s2663_s8 = inlined_call_operand.vmem [shape: f32[5,1,32], index: 8, kind: input, shape index: {}]   ;;  %s2664_s9 = inlined_call_operand.vmem [shape: f32[33,128], index: 9, kind: input, shape index: {}]   ;;  %s2665_s10 = inlined_call_operand.hbm [shape: f32[2,128], index: 10, kind: output, shape index: {}]  }
   0x1   :  { %v37_v0 = vld [vmem:[%s2655_s0] sm:$0xff]  ;;  %1891 = vset.pattern.permute.xlu0 %v2042_v2  ;;  %v64_v3 = vld [vmem:[%s2656_s1 + $0x58] sm:$0xff]  ;;  %v63_v4 = vld [vmem:[%s2656_s1 + $0x50] sm:$0xff] }
   0x2   :  { %v65_v1 = vld [vmem:[%s2656_s1 + $0x60] sm:$0xf]  ;;  %42 = vperm.xlu0 %1891, %v37_v0   ;;  %v62_v5 = vld [vmem:[%s2656_s1 + $0x48] sm:$0xff] }
   0x3   :  { %1700 = vmatpush.msk.msra.mxu0 %vm73_vm0, %v65_v1  ;;  %v61_v6 = vld [vmem:[%s2656_s1 + $0x40] sm:$0xff]  ;;  %v38_v7 = vld [vmem:[%s2655_s0 + $0x8] sm:$0xff] }
   0x5   :  { %81 = vmatpush.msra.mxu0 %v64_v3 }
   0x7   :  { %82 = vmatpush.msra.mxu0 %v63_v4 }
   0x9   :  { %83 = vmatpush.msra.mxu0 %v62_v5 }
   0xa   :  { %15 = vsyncpa [#allocation3], 0  ;;  %v60_v8 = vld [vmem:[%s2656_s1 + $0x38] sm:$0xff]  ;;  %45 = vperm.xlu0 %1891, %v38_v7   ;;  %v59_v9 = vld [vmem:[%s2656_s1 + $0x30] sm:$0xff]  ;;  %v39_v16 = vlaneseq  ;;  %vm66_vm1 = vcmask 818176   ;;  %v2043_v19 = vmov 0.0  }
   0xb   :  { %84 = vmatpush.msra.mxu0 %v61_v6  ;;  %v58_v10 = vld [vmem:[%s2656_s1 + $0x28] sm:$0xff]  ;;  %v57_v11 = vld [vmem:[%s2656_s1 + $0x20] sm:$0xff]  ;;  %v56_v12 = vld [vmem:[%s2656_s1 + $0x18] sm:$0xff]  ;;  %vm126_vm4 = vcmask 261120   ;;  %v2044_v29 = vmov 32.0   ;;  %s2045_s27 = smov 88  }
   0xc   :  { %v55_v13 = vld [vmem:[%s2656_s1 + $0x10] sm:$0xff]  ;;  %v54_v14 = vld [vmem:[%s2656_s1 + $0x8] sm:$0xff]  ;;  %v53_v15 = vld [vmem:[%s2656_s1] sm:$0xff]  ;;  %v2162_v17 = vand.u32 127, %v39_v16  ;;  %1930 = vrcp.f32 %v2044_v29  ;;  %s2046_s28 = smov 96   ;;  %s2047_s29 = smov 64  }
   0xd   :  { %85 = vmatpush.msra.mxu0 %v60_v8  ;;  %v1854_v35 = vld [vmem:[%s2659_s4 + $0x8] sm:$0xff]  ;;  %v1853_v37 = vld [vmem:[%s2659_s4] sm:$0xff]  ;;  %s2048_s30 = smov 120   ;;  %s2049_s11 = smov 112   ;;  %vm212_vm12 = vcmask 64512   ;;  %vm684_vm13 = vcmask 130048  }
   0xe   :  { %197 = vmatpush.bf16.msra.mxu1 %v1854_v35  ;;  %v1922_v58 = vld [vmem:[%s2663_s8] ss:$0 sm:$0xff]  ;;  %s2050_s12 = smov 72   ;;  %s2051_s13 = smov 104   ;;  %vm687_vm14 = vcmask 195584  }
   0xf   :  { %86 = vmatpush.msra.mxu0 %v59_v9  ;;  %s2052_s17 = smov 80   ;;  %s2054_s24 = smov 48  }
  0x10   :  { %s2055_s25 = smov 40   ;;  %s2056_s26 = smov 8  }
  0x11   :  { %87 = vmatpush.msra.mxu0 %v58_v10  ;;  %s2057_s0 = smov 16   ;;  %s2058_s14 = smov 24  }
  0x12   :  { %v1931_v30 = vpop.eup %1930  ;;  %198 = vmatpush.bf16.msra.mxu1 %v1853_v37 }
  0x13   :  { %88 = vmatpush.msra.mxu0 %v57_v11  ;;  %v134_v31 = vmul.f32 32.0, %v1931_v30  ;;  %vm138_vm5 = vweird.f32 %v1931_v30 }
  0x15   :  { %89 = vmatpush.msra.mxu0 %v56_v12  ;;  %v135_v32 = vsub.f32 1.0, %v134_v31 }
  0x17   :  { %90 = vmatpush.msra.mxu0 %v55_v13  ;;  %v136_v33 = vmul.f32 %v1931_v30, %v135_v32 }
  0x19   :  { %91 = vmatpush.msra.mxu0 %v54_v14  ;;  %v137_v34 = vadd.f32 %v1931_v30, %v136_v33  ;;  %v2244_v33 = vld [vmem:[%s2658_s3 + $0x8] sm:$0xff] }
  0x1b   :  { %92 = vmatpush.msra.mxu0 %v53_v15  ;;  %v2181_v36 = vsel %vm138_vm5, %v1931_v30, %v137_v34 }
  0x74   :  { %v43_v18 = vpop.permute.xlu0 %42 }
  0x75   :  { %vm47_vm2 = vcmp.eq.s32.totalorder %v2162_v17, %v43_v18 }
  0x76   :  { %v1698_v20 = vsel %vm47_vm2, 1.0, %v2043_v19 }
  0x77   :  { %1701 = vmatmul.msk.f32.vlgmr.msra.gmra.mxu0 %vm66_vm1, %v1698_v20 }
  0x7c   :  { %v46_v21 = vpop.permute.xlu0 %45 }
  0x7d   :  { %vm48_vm3 = vcmp.eq.s32.totalorder %v2162_v17, %v46_v21 }
  0x7e   :  { %v1699_v22 = vsel %vm48_vm3, 1.0, %v2043_v19 }
  0x7f   :  { %1702 = vmatmul.msk.f32.gmra.mxu0 %vm66_vm1, %v1699_v22  ;;  %v2229_v22 = vld [vmem:[%s2657_s2] ss:$0 sm:$0xff] }
  0x80   :  { %v2248_v34 = vadd.f32 %v2229_v22, %v2244_v33 }
  0xf4   :  { %v2168_v23 = vpop.f32.mrf.mxu0 }
  0xf5   :  { %v124_v24 = vmul.f32 %v2168_v23, %v2168_v23 }
  0xf7   :  { %v127_v25 = vsel %vm126_vm4, %v124_v24, 0.0  ;;  %v102_v24 = vld [vmem:[%s2658_s3] sm:$0xff] }
  0xf8   :  { %128 = vadd.xlane.f32.xlu1 %v127_v25  ;;  %v2235_v25 = vadd.f32 %v2229_v22, %v102_v24 }
  0xfc   :  { %v2173_v26 = vpop.f32.mrf.mxu0 }
  0xfd   :  { %v125_v27 = vmul.f32 %v2173_v26, %v2173_v26 }
  0xff   :  { %v130_v28 = vsel %vm126_vm4, %v125_v27, 0.0 }
 0x100   :  { %131 = vadd.xlane.f32.xlu1 %v130_v28 }
 0x16b   :  { %v129_v38 = vpop.xlane.xlu1 %128 }
 0x16c   :  { %v140_v39 = vmul.f32 %v2181_v36, %v129_v38 }
 0x16e   :  { %v142_v40 = vadd.f32 1e-06, %v140_v39  ;;  %v2255_v39 = vld [vmem:[%s2657_s2 + $0x1] ss:$0 sm:$0xff] }
 0x170   :  { %1932 = vrsqrt.f32 %v142_v40  ;;  %vm150_vm7 = vweird.f32 %v142_v40 }
 0x173   :  { %v132_v41 = vpop.xlane.xlu1 %131 }
 0x174   :  { %v141_v42 = vmul.f32 %v2181_v36, %v132_v41  ;;  %v2258_v41 = vadd.f32 %v2255_v39, %v102_v24 }
 0x176   :  { %v1933_v43 = vpop.eup %1932  ;;  %v143_v44 = vadd.f32 1e-06, %v141_v42 }
 0x177   :  { %v145_v45 = vmul.f32 %v1933_v43, %v142_v40  ;;  %vm151_vm6 = vweird.f32 %v1933_v43 }
 0x178   :  { %1934 = vrsqrt.f32 %v143_v44  ;;  %vm152_vm8 = vmor %vm150_vm7, %vm151_vm6  ;;  %vm160_vm10 = vweird.f32 %v143_v44  ;;  %vm836_vm7 = vcmask 523264  }
 0x179   :  { %v146_v46 = vmul.f32 %v1933_v43, %v145_v45 }
 0x17b   :  { %v147_v47 = vmul.f32 0.5, %v146_v46 }
 0x17d   :  { %v148_v48 = vsub.f32 1.5, %v147_v47 }
 0x17e   :  { %v1935_v49 = vpop.eup %1934 }
 0x17f   :  { %v155_v50 = vmul.f32 %v1935_v49, %v143_v44  ;;  %v149_v51 = vmul.f32 %v1933_v43, %v148_v48  ;;  %vm161_vm9 = vweird.f32 %v1935_v49 }
 0x180   :  { %vm162_vm11 = vmor %vm160_vm10, %vm161_vm9 }
 0x181   :  { %v156_v52 = vmul.f32 %v1935_v49, %v155_v50  ;;  %v153_v54 = vsel %vm152_vm8, %v1933_v43, %v149_v51 }
 0x182   :  { %v164_v57 = vmul.f32 %v153_v54, %v2168_v23 }
 0x183   :  { %v157_v53 = vmul.f32 0.5, %v156_v52 }
 0x184   :  { %v169_v61 = vmul.f32 %v1922_v58, %v164_v57 }
 0x185   :  { %v158_v55 = vsub.f32 1.5, %v157_v53 }
 0x187   :  { %v159_v56 = vmul.f32 %v1935_v49, %v158_v55 }
 0x189   :  { %v163_v59 = vsel %vm162_vm11, %v1935_v49, %v159_v56 }
 0x18a   :  { %v165_v60 = vmul.f32 %v163_v59, %v2173_v26 }
 0x18c   :  { %v170_v62 = vmul.f32 %v1922_v58, %v165_v60 }
 0x18e   :  { %v171_v63 = vpack.c.bf16 %v170_v62, %v169_v61 }
 0x190   :  { %1714 = vmatmul.msk.bf16.vlgmr.msra.gmra.mxu1 %vm126_vm4, %v171_v63 }
 0x20d   :  { %v200_v0 = vpop.f32.mrf.mxu1 }
 0x20e   :  { %v205_v1 = vpack.c.bf16 %v200_v0, %v200_v0 }
 0x210   :  { %v208_v2 = vunpack.c.l.b16 %v205_v1 }
 0x212   :  { %v2194_v3 = vpack.c.b16 %v208_v2, %v208_v2 }
 0x214   :  { %324 = vrot.lane.b32.xlu1 %v2194_v3, %s2045_s27  ;;  %210 = vrot.lane.b32.xlu2 %v2194_v3, %s2046_s28 }
 0x215   :  { %v202_v4 = vpop.f32.mrf.mxu1 }
 0x216   :  { %v206_v5 = vpack.c.bf16 %v202_v4, %v202_v4 }
 0x218   :  { %v233_v6 = vunpack.c.l.b16 %v206_v5 }
 0x21a   :  { %v2200_v7 = vpack.c.b16 %v233_v6, %v233_v6 }
 0x21c   :  { %235 = vrot.lane.b32.xlu0 %v2200_v7, %s2046_s28 }
 0x224   :  { %280 = vrot.lane.b32.xlu0 %v2194_v3, %s2047_s29 }
 0x22c   :  { %347 = vrot.lane.b32.xlu0 %v2200_v7, %s2045_s27 }
 0x234   :  { %322 = vrot.lane.b32.xlu0 %v2194_v3, %s2048_s30 }
 0x23c   :  { %345 = vrot.lane.b32.xlu0 %v2200_v7, %s2048_s30 }
 0x244   :  { %434 = vrot.lane.b32.xlu0 %v2194_v3, %s2049_s11 }
 0x24c   :  { %548 = vrot.lane.b32.xlu0 %v2194_v3, %s2050_s12 }
 0x254   :  { %546 = vrot.lane.b32.xlu0 %v2194_v3, %s2051_s13 }
 0x26e   :  { %v211_v8 = vpop.permute.xlu2 %210 }
 0x26f   :  { %v217_v9 = vsel %vm212_vm12, %v211_v8, 0 }
 0x270   :  { %226 = vmatpush.bf16.xpose.msra.mxu2 %v217_v9 }
 0x277   :  { %1715 = vmatmul.msk.bf16.vlgmr.msra.gmra.mxu2 %vm212_vm12, %v205_v1 }
 0x286   :  { %v325_v10 = vpop.permute.xlu1 %324 }
 0x287   :  { %v330_v13 = vsel %vm212_vm12, %v325_v10, 0 }
 0x28e   :  { %v236_v11 = vpop.permute.xlu0 %235 }
 0x28f   :  { %v241_v12 = vsel %vm212_vm12, %v236_v11, 0 }
 0x290   :  { %250 = vmatpush.bf16.xpose.msra.mxu3 %v241_v12 }
 0x296   :  { %v281_v14 = vpop.permute.xlu0 %280 }
 0x297   :  { %1716 = vmatmul.msk.bf16.vlgmr.msra.gmra.mxu3 %vm212_vm12, %v206_v5  ;;  %v286_v15 = vsel %vm73_vm0, %v281_v14, 0 }
 0x298   :  { %339 = vmatpush.bf16.xpose.msrb.mxu3 %v330_v13  ;;  %295 = vmatpush.bf16.msrb.mxu1 %v286_v15 }
 0x29e   :  { %v348_v18 = vpop.permute.xlu0 %347 }
 0x29f   :  { %v353_v20 = vsel %vm212_vm12, %v348_v18, 0  ;;  %v2293_v18 = vadd.f32 %v2255_v39, %v2244_v33 }
 0x2a0   :  { %362 = vmatpush.bf16.xpose.msra.mxu1 %v353_v20  ;;  %v1704_v20 = vld [vmem:[%s2658_s3 + $0x10] sm:$0xff] }
 0x2a6   :  { %v323_v21 = vpop.permute.xlu0 %322 }
 0x2a7   :  { %1719 = vmatmul.msk.bf16.vlgmr.msrb.gmra.mxu3 %vm212_vm12, %v323_v21 }
 0x2ae   :  { %v346_v49 = vpop.permute.xlu0 %345 }
 0x2b6   :  { %v435_v50 = vpop.permute.xlu0 %434 }
 0x2be   :  { %v549_v52 = vpop.permute.xlu0 %548 }
 0x2bf   :  { %v554_v9 = vsel %vm212_vm12, %v549_v52, 0 }
 0x2c6   :  { %v547_v56 = vpop.permute.xlu0 %546 }
 0x2fa   :  { %v228_v27 = vpop.f32.mrf.mxu2 }
 0x2fb   :  { %v229_v28 = vadd.f32 %v228_v27, %v2235_v25  ;;  %v2300_v27 = vadd.f32 %v2229_v22, %v1704_v20 }
 0x2fd   :  { %v256_v29 = vsel %vm212_vm12, %v229_v28, -inf }
 0x2fe   :  { %257 = vmax.xlane.f32.xlu2 %v256_v29 }
 0x302   :  { %v230_v30 = vpop.f32.mrf.mxu2 }
 0x316   :  { %459 = vrot.lane.b32.xlu2 %v2200_v7, %s2052_s17 }
 0x31a   :  { %v252_v31 = vpop.f32.mrf.mxu3 }
 0x31b   :  { %v253_v42 = vadd.f32 %v252_v31, %v2258_v41 }
 0x31d   :  { %v259_v43 = vsel %vm212_vm12, %v253_v42, -inf }
 0x322   :  { %v254_v32 = vpop.f32.mrf.mxu3 }
 0x32a   :  { %v341_v35 = vpop.f32.mrf.mxu3 }
 0x32b   :  { %v342_v37 = vadd.f32 %v341_v35, %v2248_v34  ;;  %v2306_v35 = vadd.f32 %v2255_v39, %v1704_v20 }
 0x32d   :  { %v368_v38 = vsel %vm212_vm12, %v342_v37, -inf }
 0x32e   :  { %369 = vmax.xlane.f32.xlu0 %v368_v38 }
 0x332   :  { %v343_v40 = vpop.f32.mrf.mxu3 }
 0x33f   :  { %260 = vmax.xlane.f32.xlu2 %v259_v43 }
 0x371   :  { %v258_v44 = vpop.xlane.xlu2 %257 }
 0x372   :  { %v262_v45 = vsub.f32 %v229_v28, %v258_v44 }
 0x374   :  { %v264_v46 = vmul.f32 1.442695, %v262_v45 }
 0x376   :  { %1936 = vpow2.f32 %v264_v46 }
 0x379   :  { %v460_v51 = vpop.permute.xlu2 %459 }
 0x37a   :  { %v465_v5 = vsel %vm212_vm12, %v460_v51, 0 }
 0x37c   :  { %v1937_v47 = vpop.eup %1936 }
 0x37d   :  { %v268_v48 = vsel %vm212_vm12, %v1937_v47, 0.0 }
 0x37e   :  { %269 = vadd.xlane.f32.xlu1 %v268_v48 }
 0x397   :  { %436 = vrot.lane.b32.xlu1 %v2194_v3, %s2052_s17 }
 0x39f   :  { %457 = vrot.lane.b32.xlu1 %v2200_v7, %s2049_s11 }
 0x3a1   :  { %v370_v59 = vpop.xlane.xlu0 %369 }
 0x3a2   :  { %v374_v60 = vsub.f32 %v342_v37, %v370_v59  ;;  %v1705_v37 = vld [vmem:[%s2658_s3 + $0x18] sm:$0xff]  ;;  %s2053_s3 = smov 56  }
 0x3a4   :  { %v376_v61 = vmul.f32 1.442695, %v374_v60 }
 0x3a7   :  { %571 = vrot.lane.b32.xlu1 %v2200_v7, %s2050_s12 }
 0x3af   :  { %569 = vrot.lane.b32.xlu1 %v2200_v7, %s2051_s13 }
 0x3b2   :  { %v261_v53 = vpop.xlane.xlu2 %260 }
 0x3b3   :  { %v263_v54 = vsub.f32 %v253_v42, %v261_v53  ;;  %v2313_v42 = vadd.f32 %v2229_v22, %v1705_v37 }
 0x3b5   :  { %v266_v55 = vmul.f32 1.442695, %v263_v54 }
 0x3b7   :  { %1938 = vpow2.f32 %v266_v55 }
 0x3b8   :  { %1940 = vpow2.f32 %v376_v61 }
 0x3bd   :  { %v2271_v57 = vpop.eup %1938 }
 0x3be   :  { %v271_v58 = vsel %vm212_vm12, %v2271_v57, 0.0  ;;  %v2275_v62 = vpop.eup %1940 }
 0x3bf   :  { %272 = vadd.xlane.f32.xlu0 %v271_v58  ;;  %v380_v63 = vsel %vm212_vm12, %v2275_v62, 0.0 }
 0x3d9   :  { %381 = vadd.xlane.f32.xlu1 %v380_v63 }
 0x3f1   :  { %v270_v0 = vpop.xlane.xlu1 %269 }
 0x3f2   :  { %1942 = vrcp.f32 %v270_v0 }
 0x3f8   :  { %v1943_v1 = vpop.eup %1942 }
 0x3f9   :  { %v276_v2 = vmul.f32 %v1943_v1, %v1937_v47 }
 0x3fb   :  { %v278_v4 = vpack.c.bf16 %v276_v2, %v276_v2 }
 0x3fd   :  { %1717 = vmatmul.msk.bf16.vlgmr.msrb.gmra.mxu1 %vm212_vm12, %v278_v4 }
 0x3fe   :  { %474 = vmatpush.bf16.xpose.msrb.mxu1 %v465_v5 }
 0x409   :  { %v437_v6 = vpop.permute.xlu1 %436 }
 0x40a   :  { %v442_v8 = vsel %vm212_vm12, %v437_v6, 0 }
 0x40b   :  { %451 = vmatpush.bf16.xpose.msrb.mxu0 %v442_v8 }
 0x40d   :  { %1720 = vmatmul.msk.bf16.vlgmr.msra.gmra.mxu1 %vm212_vm12, %v346_v49  ;;  %v2322_v49 = vadd.f32 %v2255_v39, %v1705_v37 }
 0x411   :  { %v458_v10 = vpop.permute.xlu1 %457 }
 0x412   :  { %1723 = vmatmul.msk.bf16.vlgmr.msrb.gmra.mxu0 %vm212_vm12, %v435_v50 }
 0x413   :  { %563 = vmatpush.bf16.xpose.msra.mxu0 %v554_v9 }
 0x419   :  { %v572_v11 = vpop.permute.xlu1 %571 }
 0x41a   :  { %v577_v12 = vsel %vm212_vm12, %v572_v11, 0 }
 0x41b   :  { %586 = vmatpush.bf16.xpose.msra.mxu1 %v577_v12 }
 0x41d   :  { %1724 = vmatmul.msk.bf16.vlgmr.msrb.gmra.mxu1 %vm212_vm12, %v458_v10 }
 0x421   :  { %v570_v13 = vpop.permute.xlu1 %569 }
 0x422   :  { %1727 = vmatmul.msk.bf16.vlgmr.msra.gmra.mxu0 %vm212_vm12, %v547_v56 }
 0x42d   :  { %1728 = vmatmul.msk.bf16.vlgmr.msra.gmra.mxu1 %vm212_vm12, %v570_v13 }
 0x432   :  { %v273_v59 = vpop.xlane.xlu0 %272 }
 0x44c   :  { %v382_v39 = vpop.xlane.xlu1 %381 }
 0x47a   :  { %v2289_v14 = vpop.f32.mrf.mxu1 }
 0x482   :  { %v299_v15 = vpop.f32.mrf.mxu1 }
 0x48a   :  { %v364_v21 = vpop.f32.mrf.mxu1 }
 0x48b   :  { %v365_v24 = vadd.f32 %v364_v21, %v2293_v18 }
 0x48d   :  { %v371_v28 = vsel %vm212_vm12, %v365_v24, -inf }
 0x48e   :  { %372 = vmax.xlane.f32.xlu1 %v371_v28 }
 0x48f   :  { %v453_v29 = vpop.f32.mrf.mxu0 }
 0x490   :  { %v454_v30 = vadd.f32 %v453_v29, %v2300_v27 }
 0x492   :  { %v366_v31 = vpop.f32.mrf.mxu1  ;;  %v480_v32 = vsel %vm212_vm12, %v454_v30, -inf }
 0x493   :  { %481 = vmax.xlane.f32.xlu2 %v480_v32 }
 0x497   :  { %v455_v33 = vpop.f32.mrf.mxu0 }
 0x49a   :  { %v476_v38 = vpop.f32.mrf.mxu1 }
 0x49b   :  { %v477_v40 = vadd.f32 %v476_v38, %v2306_v35 }
 0x49d   :  { %v483_v43 = vsel %vm212_vm12, %v477_v40, -inf }
 0x49e   :  { %484 = vmax.xlane.f32.xlu0 %v483_v43 }
 0x49f   :  { %v565_v44 = vpop.f32.mrf.mxu0 }
 0x4a0   :  { %v2317_v45 = vadd.f32 %v565_v44, %v2313_v42 }
 0x4a2   :  { %v478_v46 = vpop.f32.mrf.mxu1  ;;  %v592_v47 = vsel %vm212_vm12, %v2317_v45, -inf }
 0x4a3   :  { %593 = vmax.xlane.f32.xlu2 %v592_v47 }
 0x4a7   :  { %v567_v48 = vpop.f32.mrf.mxu0 }
 0x4aa   :  { %v588_v50 = vpop.f32.mrf.mxu1 }
 0x4ab   :  { %v589_v22 = vadd.f32 %v588_v50, %v2322_v49 }
 0x4ad   :  { %v595_v51 = vsel %vm212_vm12, %v589_v22, -inf }
 0x4ae   :  { %596 = vmax.xlane.f32.xlu1 %v595_v51 }
 0x4b2   :  { %v590_v52 = vpop.f32.mrf.mxu1  ;;  %413 = vrot.lane.b32.xlu0 %v2200_v7, %s2053_s3 }
 0x4ba   :  { %504 = vrot.lane.b32.xlu0 %v2194_v3, %s2054_s24 }
 0x4bb   :  { %301 = vrot.lane.b32.xlu2 %v2200_v7, %s2047_s29 }
 0x4c7   :  { %392 = vrot.lane.b32.xlu1 %v2194_v3, %s2053_s3 }
 0x501   :  { %v373_v53 = vpop.xlane.xlu1 %372 }
 0x502   :  { %v375_v54 = vsub.f32 %v365_v24, %v373_v53 }
 0x504   :  { %v378_v55 = vmul.f32 1.442695, %v375_v54 }
 0x506   :  { %1944 = vpow2.f32 %v378_v55  ;;  %v482_v56 = vpop.xlane.xlu2 %481 }
 0x507   :  { %v486_v58 = vsub.f32 %v454_v30, %v482_v56 }
 0x509   :  { %v488_v60 = vmul.f32 1.442695, %v486_v58 }
 0x50b   :  { %1946 = vpow2.f32 %v488_v60 }
 0x50c   :  { %v1945_v61 = vpop.eup %1944  ;;  %1948 = vrcp.f32 %v273_v59 }
 0x50d   :  { %v383_v63 = vsel %vm212_vm12, %v1945_v61, 0.0 }
 0x50e   :  { %384 = vadd.xlane.f32.xlu0 %v383_v63 }
 0x511   :  { %v1947_v0 = vpop.eup %1946  ;;  %v485_v1 = vpop.xlane.xlu0 %484 }
 0x512   :  { %v487_v2 = vsub.f32 %v477_v40, %v485_v1  ;;  %v492_v4 = vsel %vm212_vm12, %v1947_v0, 0.0  ;;  %v1949_v8 = vpop.eup %1948 }
 0x513   :  { %493 = vadd.xlane.f32.xlu2 %v492_v4  ;;  %v277_v10 = vmul.f32 %v1949_v8, %v2271_v57 }
 0x514   :  { %v490_v5 = vmul.f32 1.442695, %v487_v2 }
 0x515   :  { %v279_v20 = vpack.c.bf16 %v277_v10, %v277_v10 }
 0x516   :  { %1950 = vpow2.f32 %v490_v5  ;;  %v594_v6 = vpop.xlane.xlu2 %593 }
 0x517   :  { %v598_v38 = vsub.f32 %v2317_v45, %v594_v6 }
 0x519   :  { %v600_v46 = vmul.f32 1.442695, %v598_v38 }
 0x51c   :  { %v1951_v9 = vpop.eup %1950 }
 0x51d   :  { %v495_v11 = vsel %vm212_vm12, %v1951_v9, 0.0 }
 0x51e   :  { %v302_v12 = vpop.permute.xlu2 %301  ;;  %496 = vadd.xlane.f32.xlu1 %v495_v11 }
 0x51f   :  { %v307_v13 = vsel %vm73_vm0, %v302_v12, 0 }
 0x520   :  { %316 = vmatpush.bf16.msrb.mxu2 %v307_v13 }
 0x521   :  { %v597_v15 = vpop.xlane.xlu1 %596 }
 0x522   :  { %v599_v21 = vsub.f32 %v589_v22, %v597_v15  ;;  %525 = vrot.lane.b32.xlu0 %v2200_v7, %s2054_s24 }
 0x523   :  { %1718 = vmatmul.msk.bf16.vlgmr.msrb.gmra.mxu2 %vm212_vm12, %v279_v20 }
 0x524   :  { %v602_v24 = vmul.f32 1.442695, %v599_v21  ;;  %v414_v28 = vpop.permute.xlu0 %413 }
 0x525   :  { %v419_v29 = vsel %vm73_vm0, %v414_v28, 0 }
 0x526   :  { %1952 = vpow2.f32 %v602_v24  ;;  %428 = vmatpush.bf16.msra.mxu3 %v419_v29 }
 0x527   :  { %1954 = vrcp.f32 %v382_v39 }
 0x528   :  { %1956 = vpow2.f32 %v600_v46 }
 0x52c   :  { %v1953_v57 = vpop.eup %1952  ;;  %v505_v33 = vpop.permute.xlu0 %504 }
 0x52d   :  { %v607_v30 = vsel %vm212_vm12, %v1953_v57, 0.0  ;;  %v1955_v31 = vpop.eup %1954  ;;  %v510_v43 = vsel %vm73_vm0, %v505_v33, 0 }
 0x52e   :  { %608 = vadd.xlane.f32.xlu2 %v607_v30  ;;  %v388_v32 = vmul.f32 %v1955_v31, %v2275_v62 }
 0x530   :  { %v390_v44 = vpack.c.bf16 %v388_v32, %v388_v32 }
 0x537   :  { %637 = vrot.lane.b32.xlu1 %v2200_v7, %s2055_s25  ;;  %v1957_v7 = vpop.eup %1956 }
 0x538   :  { %v604_v62 = vsel %vm212_vm12, %v1957_v7, 0.0 }
 0x539   :  { %v393_v37 = vpop.permute.xlu1 %392 }
 0x53a   :  { %v398_v40 = vsel %vm73_vm0, %v393_v37, 0 }
 0x53b   :  { %407 = vmatpush.bf16.msra.mxu2 %v398_v40  ;;  %v1856_v40 = vld [vmem:[%s2660_s5 + $0x8] sm:$0xff] }
 0x53c   :  { %716 = vmatpush.bf16.msrb.mxu0 %v1856_v40 }
 0x53e   :  { %1721 = vmatmul.msk.bf16.vlgmr.msra.gmra.mxu2 %vm212_vm12, %v390_v44 }
 0x53f   :  { %519 = vmatpush.bf16.msrb.mxu2 %v510_v43  ;;  %v1855_v43 = vld [vmem:[%s2660_s5] sm:$0xff] }
 0x540   :  { %717 = vmatpush.bf16.msrb.mxu0 %v1855_v43 }
 0x546   :  { %616 = vrot.lane.b32.xlu2 %v2194_v3, %s2055_s25 }
 0x54c   :  { %605 = vadd.xlane.f32.xlu0 %v604_v62 }
 0x581   :  { %v385_v47 = vpop.xlane.xlu0 %384 }
 0x582   :  { %1958 = vrcp.f32 %v385_v47 }
 0x586   :  { %v494_v45 = vpop.xlane.xlu2 %493 }
 0x587   :  { %1960 = vrcp.f32 %v494_v45 }
 0x588   :  { %v1959_v48 = vpop.eup %1958 }
 0x589   :  { %v389_v50 = vmul.f32 %v1959_v48, %v1945_v61 }
 0x58b   :  { %v391_v22 = vpack.c.bf16 %v389_v50, %v389_v50 }
 0x58d   :  { %v1961_v51 = vpop.eup %1960  ;;  %1722 = vmatmul.msk.bf16.vlgmr.msra.gmra.mxu3 %vm212_vm12, %v391_v22 }
 0x58e   :  { %v500_v52 = vmul.f32 %v1961_v51, %v1947_v0 }
 0x590   :  { %v502_v39 = vpack.c.bf16 %v500_v52, %v500_v52 }
 0x591   :  { %v497_v53 = vpop.xlane.xlu1 %496 }
 0x592   :  { %1962 = vrcp.f32 %v497_v53  ;;  %1725 = vmatmul.msk.bf16.vlgmr.msrb.gmra.mxu2 %vm212_vm12, %v502_v39 }
 0x594   :  { %v526_v3 = vpop.permute.xlu0 %525 }
 0x595   :  { %v531_v54 = vsel %vm73_vm0, %v526_v3, 0 }
 0x596   :  { %540 = vmatpush.bf16.msrb.mxu3 %v531_v54 }
 0x598   :  { %v1963_v55 = vpop.eup %1962 }
 0x599   :  { %v501_v56 = vmul.f32 %v1963_v55, %v1951_v9 }
 0x59b   :  { %v503_v58 = vpack.c.bf16 %v501_v56, %v501_v56 }
 0x59d   :  { %1726 = vmatmul.msk.bf16.vlgmr.msrb.gmra.mxu3 %vm212_vm12, %v503_v58 }
 0x5a1   :  { %v609_v59 = vpop.xlane.xlu2 %608 }
 0x5a2   :  { %1964 = vrcp.f32 %v609_v59 }
 0x5a6   :  { %v318_v60 = vpop.f32.mrf.mxu2 }
 0x5a8   :  { %v1965_v61 = vpop.eup %1964 }
 0x5a9   :  { %v613_v63 = vmul.f32 %v1965_v61, %v1953_v57  ;;  %v617_v0 = vpop.permute.xlu2 %616  ;;  %v638_v1 = vpop.permute.xlu1 %637 }
 0x5aa   :  { %v622_v2 = vsel %vm73_vm0, %v617_v0, 0  ;;  %v643_v4 = vsel %vm73_vm0, %v638_v1, 0 }
 0x5ab   :  { %v615_v5 = vpack.c.bf16 %v613_v63, %v613_v63  ;;  %631 = vmatpush.bf16.msra.mxu2 %v622_v2  ;;  %652 = vmatpush.bf16.msra.mxu3 %v643_v4  ;;  %v1857_v4 = vld [vmem:[%s2661_s6] sm:$0xff] }
 0x5ae   :  { %v320_v6 = vpop.f32.mrf.mxu2  ;;  %1730 = vmatmul.msk.bf16.vlgmr.msra.gmra.mxu3 %vm212_vm12, %v615_v5  ;;  %v1862_v5 = vld [vmem:[%s2662_s7 + $0x18] sm:$0xff] }
 0x5af   :  { %844 = vmatpush.bf16.msrb.mxu2 %v1862_v5 }
 0x5bf   :  { %v606_v8 = vpop.xlane.xlu0 %605 }
 0x5c0   :  { %1966 = vrcp.f32 %v606_v8 }
 0x5c1   :  { %v409_v9 = vpop.f32.mrf.mxu2 }
 0x5c6   :  { %v1967_v10 = vpop.eup %1966 }
 0x5c7   :  { %v612_v11 = vmul.f32 %v1967_v10, %v1957_v7 }
 0x5c9   :  { %v614_v12 = vpack.c.bf16 %v612_v11, %v612_v11  ;;  %v411_v13 = vpop.f32.mrf.mxu2 }
 0x5cb   :  { %1729 = vmatmul.msk.bf16.vlgmr.msra.gmra.mxu2 %vm212_vm12, %v614_v12 }
 0x610   :  { %v430_v15 = vpop.f32.mrf.mxu3 }
 0x611   :  { %v1892_v20 = vpack.i.bf16 %v430_v15, %v409_v9 }
 0x613   :  { %1893 = vrot.lane.b32.xlu0 %v1892_v20, %s2056_s26 }
 0x615   :  { %v521_v21 = vpop.f32.mrf.mxu2 }
 0x618   :  { %v432_v24 = vpop.f32.mrf.mxu3 }
 0x61d   :  { %v523_v28 = vpop.f32.mrf.mxu2 }
 0x620   :  { %v542_v29 = vpop.f32.mrf.mxu3 }
 0x621   :  { %v1897_v57 = vpack.i.bf16 %v542_v29, %v521_v21 }
 0x623   :  { %1898 = vrot.lane.b32.xlu2 %v1897_v57, %s2057_s0 }
 0x628   :  { %v544_v30 = vpop.f32.mrf.mxu3 }
 0x631   :  { %v654_v31 = vpop.f32.mrf.mxu3 }
 0x639   :  { %v656_v32 = vpop.f32.mrf.mxu3 }
 0x63a   :  { %v1925_v32 = vld [vmem:[%s2663_s8 + $0x1] ss:$0 sm:$0xff] }
 0x64e   :  { %v633_v33 = vpop.f32.mrf.mxu2 }
 0x64f   :  { %v1902_v37 = vpack.i.bf16 %v654_v31, %v633_v33 }
 0x651   :  { %1903 = vrot.lane.b32.xlu1 %v1902_v37, %s2058_s14 }
 0x656   :  { %v635_v38 = vpop.f32.mrf.mxu2 }
 0x67d   :  { %v1899_v62 = vpop.permute.xlu2 %1898 }
 0x67e   :  { %v1901_v48 = vunpack.i.h.bf16 %v1899_v62  ;;  %v1900_v50 = vunpack.i.l.bf16 %v1899_v62  ;;  %v1859_v62 = vld [vmem:[%s2662_s7] sm:$0xff] }
 0x685   :  { %v1894_v44 = vpop.permute.xlu0 %1893 }
 0x686   :  { %v1896_v46 = vunpack.i.h.bf16 %v1894_v44  ;;  %v1895_v7 = vunpack.i.l.bf16 %v1894_v44 }
 0x688   :  { %v683_v47 = vsel %vm212_vm12, %v318_v60, %v1896_v46  ;;  %v682_v45 = vsel %vm212_vm12, %v2289_v14, %v1895_v7  ;;  %v1861_v46 = vld [vmem:[%s2662_s7 + $0x10] sm:$0xff]  ;;  %v1860_v7 = vld [vmem:[%s2662_s7 + $0x8] sm:$0xff] }
 0x689   :  { %v685_v39 = vsel %vm684_vm13, %v682_v45, %v1900_v50  ;;  %v686_v53 = vsel %vm684_vm13, %v683_v47, %v1901_v48  ;;  %845 = vmatpush.bf16.msrb.mxu2 %v1861_v46 }
 0x68d   :  { %846 = vmatpush.bf16.msrb.mxu2 %v1860_v7 }
 0x691   :  { %847 = vmatpush.bf16.msrb.mxu2 %v1859_v62 }
 0x6c3   :  { %v1904_v22 = vpop.permute.xlu1 %1903 }
 0x6c4   :  { %v1906_v51 = vunpack.i.h.bf16 %v1904_v22  ;;  %v1905_v52 = vunpack.i.l.bf16 %v1904_v22 }
 0x6c6   :  { %v688_v3 = vsel %vm687_vm14, %v685_v39, %v1905_v52  ;;  %v689_v54 = vsel %vm687_vm14, %v686_v53, %v1906_v51 }
 0x6c7   :  { %v690_v55 = vpack.c.bf16 %v689_v54, %v688_v3 }
 0x6c9   :  { %1739 = vmatmul.msk.bf16.vlgmr.msrb.gmra.mxu0 %vm126_vm4, %v690_v55 }
 0x746   :  { %v719_v56 = vpop.f32.mrf.mxu0 }
 0x747   :  { %v2380_v14 = vadd.f32 %v719_v56, %v2168_v23  ;;  %v1858_v23 = vld [vmem:[%s2661_s6 + $0x8] sm:$0xff] }
 0x748   :  { %793 = vmatpush.bf16.msrb.mxu1 %v1858_v23 }
 0x749   :  { %v728_v58 = vmul.f32 %v2380_v14, %v2380_v14 }
 0x74b   :  { %v730_v59 = vsel %vm126_vm4, %v728_v58, 0.0 }
 0x74c   :  { %731 = vadd.xlane.f32.xlu2 %v730_v59  ;;  %794 = vmatpush.bf16.msrb.mxu1 %v1857_v4 }
 0x74e   :  { %v721_v60 = vpop.f32.mrf.mxu0 }
 0x74f   :  { %v2386_v61 = vadd.f32 %v721_v60, %v2173_v26  ;;  %v1863_v60 = vld [vmem:[%s2659_s4 + $0x10] sm:$0xff] }
 0x751   :  { %v729_v63 = vmul.f32 %v2386_v61, %v2386_v61 }
 0x753   :  { %v733_v0 = vsel %vm126_vm4, %v729_v63, 0.0 }
 0x754   :  { %734 = vadd.xlane.f32.xlu1 %v733_v0 }
 0x7bf   :  { %v732_v1 = vpop.xlane.xlu2 %731 }
 0x7c0   :  { %v736_v2 = vmul.f32 %v732_v1, %v2181_v36 }
 0x7c2   :  { %v738_v26 = vadd.f32 1e-06, %v736_v2 }
 0x7c4   :  { %1968 = vrsqrt.f32 %v738_v26  ;;  %vm746_vm1 = vweird.f32 %v738_v26 }
 0x7c7   :  { %v735_v6 = vpop.xlane.xlu1 %734 }
 0x7c8   :  { %v737_v8 = vmul.f32 %v735_v6, %v2181_v36 }
 0x7ca   :  { %v1969_v9 = vpop.eup %1968  ;;  %v739_v10 = vadd.f32 1e-06, %v737_v8 }
 0x7cb   :  { %v741_v11 = vmul.f32 %v1969_v9, %v738_v26  ;;  %vm747_vm15 = vweird.f32 %v1969_v9 }
 0x7cc   :  { %1970 = vrsqrt.f32 %v739_v10  ;;  %vm748_vm2 = vmor %vm746_vm1, %vm747_vm15  ;;  %vm756_vm5 = vweird.f32 %v739_v10 }
 0x7cd   :  { %v742_v12 = vmul.f32 %v1969_v9, %v741_v11 }
 0x7cf   :  { %v743_v13 = vmul.f32 0.5, %v742_v12 }
 0x7d1   :  { %v744_v15 = vsub.f32 1.5, %v743_v13 }
 0x7d2   :  { %v1971_v20 = vpop.eup %1970 }
 0x7d3   :  { %v751_v21 = vmul.f32 %v1971_v20, %v739_v10  ;;  %v745_v24 = vmul.f32 %v1969_v9, %v744_v15  ;;  %vm757_vm3 = vweird.f32 %v1971_v20 }
 0x7d4   :  { %vm758_vm6 = vmor %vm756_vm5, %vm757_vm3 }
 0x7d5   :  { %v752_v28 = vmul.f32 %v1971_v20, %v751_v21  ;;  %v749_v57 = vsel %vm748_vm2, %v1969_v9, %v745_v24 }
 0x7d6   :  { %v760_v33 = vmul.f32 %v749_v57, %v2380_v14 }
 0x7d7   :  { %v753_v29 = vmul.f32 0.5, %v752_v28 }
 0x7d8   :  { %v765_v40 = vmul.f32 %v1925_v32, %v760_v33 }
 0x7d9   :  { %v754_v30 = vsub.f32 1.5, %v753_v29 }
 0x7db   :  { %v755_v31 = vmul.f32 %v1971_v20, %v754_v30 }
 0x7dd   :  { %v759_v37 = vsel %vm758_vm6, %v1971_v20, %v755_v31  ;;  %v1926_v20 = vld [vmem:[%s2663_s8 + $0x2] ss:$0 sm:$0xff] }
 0x7de   :  { %v761_v38 = vmul.f32 %v759_v37, %v2386_v61 }
 0x7e0   :  { %v766_v43 = vmul.f32 %v1925_v32, %v761_v38 }
 0x7e2   :  { %v767_v44 = vpack.c.bf16 %v766_v43, %v765_v40 }
 0x7e4   :  { %1749 = vmatmul.msk.bf16.vlgmr.msrb.gmra.mxu1 %vm126_vm4, %v767_v44 }
 0x861   :  { %v796_v47 = vpop.f32.mrf.mxu1 }
 0x862   :  { %v801_v48 = vmax.f32 %v796_v47, 0.0 }
 0x869   :  { %v798_v45 = vpop.f32.mrf.mxu1 }
 0x86a   :  { %v802_v50 = vmax.f32 %v798_v45, 0.0 }
 0x86c   :  { %v803_v22 = vpack.c.bf16 %v802_v50, %v801_v48 }
 0x86e   :  { %1766 = vmatmul.msk.bf16.vlgmr.msrb.gmra.mxu2 %vm836_vm7, %v803_v22 }
 0x8f1   :  { %v849_v51 = vpop.f32.mrf.mxu2 }
 0x8f2   :  { %v2419_v52 = vadd.f32 %v849_v51, %v2380_v14  ;;  %v1864_v14 = vld [vmem:[%s2659_s4 + $0x18] sm:$0xff] }
 0x8f3   :  { %924 = vmatpush.bf16.msrb.mxu3 %v1864_v14 }
 0x8f4   :  { %v858_v39 = vmul.f32 %v2419_v52, %v2419_v52 }
 0x8f6   :  { %v860_v53 = vsel %vm126_vm4, %v858_v39, 0.0 }
 0x8f7   :  { %861 = vadd.xlane.f32.xlu0 %v860_v53  ;;  %925 = vmatpush.bf16.msrb.mxu3 %v1863_v60 }
 0x8f9   :  { %v851_v3 = vpop.f32.mrf.mxu2 }
 0x8fa   :  { %v2425_v54 = vadd.f32 %v851_v3, %v2386_v61 }
 0x8fc   :  { %v859_v55 = vmul.f32 %v2425_v54, %v2425_v54 }
 0x8fe   :  { %v863_v56 = vsel %vm126_vm4, %v859_v55, 0.0 }
 0x8ff   :  { %864 = vadd.xlane.f32.xlu2 %v863_v56 }
 0x96a   :  { %v862_v58 = vpop.xlane.xlu0 %861 }
 0x96b   :  { %v866_v59 = vmul.f32 %v862_v58, %v2181_v36 }
 0x96d   :  { %v868_v61 = vadd.f32 1e-06, %v866_v59 }
 0x96f   :  { %1972 = vrsqrt.f32 %v868_v61  ;;  %vm876_vm9 = vweird.f32 %v868_v61 }
 0x972   :  { %v865_v63 = vpop.xlane.xlu2 %864 }
 0x973   :  { %v867_v0 = vmul.f32 %v865_v63, %v2181_v36 }
 0x975   :  { %v1973_v23 = vpop.eup %1972  ;;  %v869_v1 = vadd.f32 1e-06, %v867_v0 }
 0x976   :  { %v871_v2 = vmul.f32 %v1973_v23, %v868_v61  ;;  %vm877_vm8 = vweird.f32 %v1973_v23 }
 0x977   :  { %1974 = vrsqrt.f32 %v869_v1  ;;  %vm878_vm10 = vmor %vm876_vm9, %vm877_vm8  ;;  %vm886_vm15 = vweird.f32 %v869_v1 }
 0x978   :  { %v872_v4 = vmul.f32 %v1973_v23, %v871_v2 }
 0x97a   :  { %v873_v26 = vmul.f32 0.5, %v872_v4 }
 0x97c   :  { %v874_v5 = vsub.f32 1.5, %v873_v26 }
 0x97d   :  { %v1975_v6 = vpop.eup %1974 }
 0x97e   :  { %v881_v8 = vmul.f32 %v1975_v6, %v869_v1  ;;  %v875_v9 = vmul.f32 %v1973_v23, %v874_v5  ;;  %vm887_vm11 = vweird.f32 %v1975_v6 }
 0x97f   :  { %vm888_vm1 = vmor %vm886_vm15, %vm887_vm11 }
 0x980   :  { %v882_v10 = vmul.f32 %v1975_v6, %v881_v8  ;;  %v879_v12 = vsel %vm878_vm10, %v1973_v23, %v875_v9 }
 0x981   :  { %v890_v21 = vmul.f32 %v879_v12, %v2419_v52 }
 0x982   :  { %v883_v11 = vmul.f32 0.5, %v882_v10 }
 0x983   :  { %v895_v29 = vmul.f32 %v1926_v20, %v890_v21 }
 0x984   :  { %v884_v13 = vsub.f32 1.5, %v883_v11 }
 0x986   :  { %v885_v15 = vmul.f32 %v1975_v6, %v884_v13 }
 0x988   :  { %v889_v24 = vsel %vm888_vm1, %v1975_v6, %v885_v15 }
 0x989   :  { %v891_v28 = vmul.f32 %v889_v24, %v2425_v54 }
 0x98b   :  { %v896_v57 = vmul.f32 %v1926_v20, %v891_v28 }
 0x98d   :  { %v897_v30 = vpack.c.bf16 %v896_v57, %v895_v29 }
 0x98f   :  { %1780 = vmatmul.msk.bf16.vlgmr.msrb.gmra.mxu3 %vm126_vm4, %v897_v30 }
 0xa12   :  { %v927_v31 = vpop.f32.mrf.mxu3 }
 0xa13   :  { %v932_v32 = vpack.c.bf16 %v927_v31, %v927_v31 }
 0xa15   :  { %v935_v33 = vunpack.c.l.b16 %v932_v32 }
 0xa17   :  { %v2444_v37 = vpack.c.b16 %v935_v33, %v935_v33 }
 0xa19   :  { %1050 = vrot.lane.b32.xlu0 %v2444_v37, %s2045_s27  ;;  %937 = vrot.lane.b32.xlu1 %v2444_v37, %s2046_s28 }
 0xa1a   :  { %v929_v38 = vpop.f32.mrf.mxu3 }
 0xa1b   :  { %v933_v40 = vpack.c.bf16 %v929_v38, %v929_v38 }
 0xa1d   :  { %v959_v43 = vunpack.c.l.b16 %v933_v40 }
 0xa1f   :  { %v2450_v44 = vpack.c.b16 %v959_v43, %v959_v43 }
 0xa21   :  { %1048 = vrot.lane.b32.xlu1 %v2444_v37, %s2048_s30  ;;  %1073 = vrot.lane.b32.xlu0 %v2450_v44, %s2045_s27 }
 0xa22   :  { %961 = vrot.lane.b32.xlu2 %v2450_v44, %s2046_s28 }
 0xa29   :  { %1185 = vrot.lane.b32.xlu1 %v2450_v44, %s2052_s17  ;;  %1162 = vrot.lane.b32.xlu0 %v2444_v37, %s2052_s17 }
 0xa2a   :  { %1071 = vrot.lane.b32.xlu2 %v2450_v44, %s2048_s30 }
 0xa31   :  { %1274 = vrot.lane.b32.xlu1 %v2444_v37, %s2050_s12  ;;  %1183 = vrot.lane.b32.xlu0 %v2450_v44, %s2049_s11 }
 0xa32   :  { %1160 = vrot.lane.b32.xlu2 %v2444_v37, %s2049_s11  ;;  %s1689_s11 = sshll.u32 %s2665_s10, 4  ;;  %s1690_s11 = int_to_ptr.hbm [resolvable:$true] %s1689_s11 }
 0xa39   :  { %1295 = vrot.lane.b32.xlu1 %v2450_v44, %s2051_s13  ;;  %1272 = vrot.lane.b32.xlu0 %v2444_v37, %s2051_s13 }
 0xa3a   :  { %1297 = vrot.lane.b32.xlu2 %v2450_v44, %s2050_s12 }
 0xa41   :  { %1006 = vrot.lane.b32.xlu0 %v2444_v37, %s2047_s29 }
 0xa7c   :  { %v962_v46 = vpop.permute.xlu2 %961 }
 0xa7d   :  { %v967_v7 = vsel %vm212_vm12, %v962_v46, 0 }
 0xa7e   :  { %976 = vmatpush.bf16.xpose.msra.mxu1 %v967_v7 }
 0xa84   :  { %v1072_v62 = vpop.permute.xlu2 %1071 }
 0xa85   :  { %1782 = vmatmul.msk.bf16.vlgmr.msra.gmra.mxu1 %vm212_vm12, %v933_v40 }
 0xa8b   :  { %v1051_v47 = vpop.permute.xlu0 %1050  ;;  %v938_v45 = vpop.permute.xlu1 %937 }
 0xa8c   :  { %v1056_v48 = vsel %vm212_vm12, %v1051_v47, 0  ;;  %v943_v50 = vsel %vm212_vm12, %v938_v45, 0  ;;  %v1161_v22 = vpop.permute.xlu2 %1160 }
 0xa8d   :  { %952 = vmatpush.bf16.xpose.msra.mxu0 %v943_v50 }
 0xa93   :  { %v1049_v51 = vpop.permute.xlu1 %1048  ;;  %v1074_v39 = vpop.permute.xlu0 %1073 }
 0xa94   :  { %v1079_v53 = vsel %vm212_vm12, %v1074_v39, 0  ;;  %1781 = vmatmul.msk.bf16.vlgmr.msra.gmra.mxu0 %vm212_vm12, %v932_v32  ;;  %v1298_v3 = vpop.permute.xlu2 %1297 }
 0xa95   :  { %1065 = vmatpush.bf16.xpose.msrb.mxu0 %v1056_v48  ;;  %1088 = vmatpush.bf16.xpose.msrb.mxu1 %v1079_v53  ;;  %v1303_v59 = vsel %vm212_vm12, %v1298_v3, 0 }
 0xa9b   :  { %v1186_v55 = vpop.permute.xlu1 %1185  ;;  %v1163_v56 = vpop.permute.xlu0 %1162 }
 0xa9c   :  { %v1191_v14 = vsel %vm212_vm12, %v1186_v55, 0  ;;  %v1168_v58 = vsel %vm212_vm12, %v1163_v56, 0  ;;  %1786 = vmatmul.msk.bf16.vlgmr.msrb.gmra.mxu1 %vm212_vm12, %v1072_v62 }
 0xa9d   :  { %1177 = vmatpush.bf16.xpose.msra.mxu0 %v1168_v58  ;;  %1200 = vmatpush.bf16.xpose.msra.mxu1 %v1191_v14 }
 0xaa3   :  { %v1275_v60 = vpop.permute.xlu1 %1274  ;;  %v1184_v61 = vpop.permute.xlu0 %1183 }
 0xaa4   :  { %v1280_v63 = vsel %vm212_vm12, %v1275_v60, 0  ;;  %1785 = vmatmul.msk.bf16.vlgmr.msrb.gmra.mxu0 %vm212_vm12, %v1049_v51 }
 0xaa5   :  { %1312 = vmatpush.bf16.xpose.msrb.mxu1 %v1303_v59  ;;  %1289 = vmatpush.bf16.xpose.msrb.mxu0 %v1280_v63 }
 0xaab   :  { %v1273_v0 = vpop.permute.xlu0 %1272  ;;  %v1296_v2 = vpop.permute.xlu1 %1295 }
 0xaac   :  { %1790 = vmatmul.msk.bf16.vlgmr.msra.gmra.mxu1 %vm212_vm12, %v1184_v61 }
 0xab3   :  { %v1007_v23 = vpop.permute.xlu0 %1006 }
 0xab4   :  { %v1012_v1 = vsel %vm73_vm0, %v1007_v23, 0  ;;  %1789 = vmatmul.msk.bf16.vlgmr.msra.gmra.mxu0 %vm212_vm12, %v1161_v22 }
 0xab5   :  { %1021 = vmatpush.bf16.msra.mxu2 %v1012_v1 }
 0xabc   :  { %1794 = vmatmul.msk.bf16.vlgmr.msrb.gmra.mxu1 %vm212_vm12, %v1296_v2 }
 0xac4   :  { %1793 = vmatmul.msk.bf16.vlgmr.msrb.gmra.mxu0 %vm212_vm12, %v1273_v0 }
 0xb02   :  { %v978_v4 = vpop.f32.mrf.mxu1 }
 0xb03   :  { %v979_v26 = vadd.f32 %v978_v4, %v2258_v41 }
 0xb05   :  { %v985_v5 = vsel %vm212_vm12, %v979_v26, -inf }
 0xb06   :  { %986 = vmax.xlane.f32.xlu0 %v985_v5 }
 0xb0a   :  { %v980_v6 = vpop.f32.mrf.mxu1 }
 0xb11   :  { %v954_v8 = vpop.f32.mrf.mxu0 }
 0xb12   :  { %v955_v9 = vadd.f32 %v954_v8, %v2235_v25 }
 0xb14   :  { %v982_v10 = vsel %vm212_vm12, %v955_v9, -inf }
 0xb15   :  { %983 = vmax.xlane.f32.xlu2 %v982_v10 }
 0xb19   :  { %v956_v11 = vpop.f32.mrf.mxu0  ;;  %v1090_v12 = vpop.f32.mrf.mxu1 }
 0xb1a   :  { %v1091_v13 = vadd.f32 %v1090_v12, %v2293_v18 }
 0xb1c   :  { %v1097_v15 = vsel %vm212_vm12, %v1091_v13, -inf }
 0xb1d   :  { %1098 = vmax.xlane.f32.xlu2 %v1097_v15 }
 0xb21   :  { %v1067_v20 = vpop.f32.mrf.mxu0  ;;  %v1092_v21 = vpop.f32.mrf.mxu1 }
 0xb22   :  { %v1068_v41 = vadd.f32 %v1067_v20, %v2248_v34 }
 0xb24   :  { %v1094_v24 = vsel %vm212_vm12, %v1068_v41, -inf }
 0xb25   :  { %1095 = vmax.xlane.f32.xlu1 %v1094_v24 }
 0xb29   :  { %v1069_v28 = vpop.f32.mrf.mxu0  ;;  %v1202_v29 = vpop.f32.mrf.mxu1 }
 0xb2a   :  { %v1203_v25 = vadd.f32 %v1202_v29, %v2306_v35 }
 0xb2c   :  { %v1209_v57 = vsel %vm212_vm12, %v1203_v25, -inf }
 0xb2d   :  { %1210 = vmax.xlane.f32.xlu1 %v1209_v57 }
 0xb31   :  { %v1179_v30 = vpop.f32.mrf.mxu0  ;;  %v1204_v31 = vpop.f32.mrf.mxu1 }
 0xb32   :  { %v1180_v18 = vadd.f32 %v1179_v30, %v2300_v27 }
 0xb34   :  { %v1206_v32 = vsel %vm212_vm12, %v1180_v18, -inf }
 0xb35   :  { %1118 = vrot.lane.b32.xlu2 %v2444_v37, %s2053_s3  ;;  %1207 = vmax.xlane.f32.xlu0 %v1206_v32 }
 0xb39   :  { %v1181_v34 = vpop.f32.mrf.mxu0  ;;  %v1314_v33 = vpop.f32.mrf.mxu1 }
 0xb3a   :  { %v1315_v38 = vadd.f32 %v1314_v33, %v2322_v49 }
 0xb3c   :  { %v1321_v40 = vsel %vm212_vm12, %v1315_v38, -inf }
 0xb3d   :  { %1322 = vmax.xlane.f32.xlu0 %v1321_v40 }
 0xb41   :  { %v1291_v35 = vpop.f32.mrf.mxu0  ;;  %v1316_v43 = vpop.f32.mrf.mxu1 }
 0xb42   :  { %v2516_v27 = vadd.f32 %v1291_v35, %v2313_v42 }
 0xb44   :  { %v1318_v7 = vsel %vm212_vm12, %v2516_v27, -inf }
 0xb46   :  { %1027 = vrot.lane.b32.xlu1 %v2450_v44, %s2047_s29  ;;  %s2059_s29 = smov [#allocation2]  }
 0xb49   :  { %v1293_v46 = vpop.f32.mrf.mxu0 }
 0xb51   :  { %1139 = vrot.lane.b32.xlu0 %v2450_v44, %s2053_s3 }
 0xb5e   :  { %1319 = vmax.xlane.f32.xlu2 %v1318_v7 }
 0xb76   :  { %1230 = vrot.lane.b32.xlu2 %v2444_v37, %s2054_s24 }
 0xb79   :  { %v987_v47 = vpop.xlane.xlu0 %986 }
 0xb7a   :  { %v989_v48 = vsub.f32 %v979_v26, %v987_v47 }
 0xb7c   :  { %v992_v22 = vmul.f32 1.442695, %v989_v48 }
 0xb88   :  { %v984_v49 = vpop.xlane.xlu2 %983 }
 0xb89   :  { %v988_v62 = vsub.f32 %v955_v9, %v984_v49 }
 0xb8b   :  { %v990_v45 = vmul.f32 1.442695, %v988_v62 }
 0xb8d   :  { %1976 = vpow2.f32 %v990_v45 }
 0xb8e   :  { %1978 = vpow2.f32 %v992_v22 }
 0xb90   :  { %v1099_v50 = vpop.xlane.xlu2 %1098 }
 0xb91   :  { %v1101_v58 = vsub.f32 %v1091_v13, %v1099_v50 }
 0xb93   :  { %v2522_v51 = vpop.eup %1976  ;;  %v1104_v60 = vmul.f32 1.442695, %v1101_v58 }
 0xb94   :  { %v994_v42 = vsel %vm212_vm12, %v2522_v51, 0.0  ;;  %v2527_v56 = vpop.eup %1978 }
 0xb95   :  { %995 = vadd.xlane.f32.xlu1 %v994_v42  ;;  %v997_v59 = vsel %vm212_vm12, %v2527_v56, 0.0 }
 0xb98   :  { %v1096_v39 = vpop.xlane.xlu1 %1095  ;;  %v1119_v53 = vpop.permute.xlu2 %1118 }
 0xb99   :  { %v1100_v3 = vsub.f32 %v1068_v41, %v1096_v39  ;;  %v1124_v55 = vsel %vm73_vm0, %v1119_v53, 0 }
 0xb9a   :  { %1133 = vmatpush.bf16.msrb.mxu2 %v1124_v55 }
 0xb9b   :  { %v1102_v14 = vmul.f32 1.442695, %v1100_v3 }
 0xb9d   :  { %1980 = vpow2.f32 %v1102_v14 }
 0xb9e   :  { %1982 = vpow2.f32 %v1104_v60 }
 0xb9f   :  { %998 = vadd.xlane.f32.xlu2 %v997_v59 }
 0xba0   :  { %v1211_v61 = vpop.xlane.xlu1 %1210 }
 0xba1   :  { %v1213_v63 = vsub.f32 %v1203_v25, %v1211_v61 }
 0xba3   :  { %v1981_v0 = vpop.eup %1980  ;;  %v1216_v23 = vmul.f32 1.442695, %v1213_v63 }
 0xba4   :  { %v1106_v1 = vsel %vm212_vm12, %v1981_v0, 0.0  ;;  %v1983_v26 = vpop.eup %1982 }
 0xba5   :  { %1984 = vpow2.f32 %v1216_v23  ;;  %v1109_v9 = vsel %vm212_vm12, %v1983_v26, 0.0 }
 0xba7   :  { %1107 = vadd.xlane.f32.xlu2 %v1106_v1 }
 0xba8   :  { %v1208_v2 = vpop.xlane.xlu0 %1207 }
 0xba9   :  { %v1212_v4 = vsub.f32 %v1180_v18, %v1208_v2 }
 0xbab   :  { %v2532_v5 = vpop.eup %1984  ;;  %v1214_v6 = vmul.f32 1.442695, %v1212_v4 }
 0xbac   :  { %v1221_v8 = vsel %vm212_vm12, %v2532_v5, 0.0 }
 0xbad   :  { %1986 = vpow2.f32 %v1214_v6  ;;  %1222 = vadd.xlane.f32.xlu0 %v1221_v8 }
 0xbaf   :  { %1110 = vadd.xlane.f32.xlu2 %v1109_v9 }
 0xbb0   :  { %v1323_v10 = vpop.xlane.xlu0 %1322 }
 0xbb1   :  { %v1325_v11 = vsub.f32 %v1315_v38, %v1323_v10 }
 0xbb3   :  { %v1987_v12 = vpop.eup %1986  ;;  %v1328_v13 = vmul.f32 1.442695, %v1325_v11 }
 0xbb4   :  { %v1218_v15 = vsel %vm212_vm12, %v1987_v12, 0.0 }
 0xbb5   :  { %1988 = vpow2.f32 %v1328_v13  ;;  %1219 = vadd.xlane.f32.xlu1 %v1218_v15 }
 0xbb8   :  { %v1028_v20 = vpop.permute.xlu1 %1027 }
 0xbb9   :  { %v1033_v21 = vsel %vm73_vm0, %v1028_v20, 0 }
 0xbba   :  { %1042 = vmatpush.bf16.msra.mxu3 %v1033_v21 }
 0xbbb   :  { %v2539_v41 = vpop.eup %1988 }
 0xbbc   :  { %v1333_v24 = vsel %vm212_vm12, %v2539_v41, 0.0 }
 0xbbd   :  { %1334 = vadd.xlane.f32.xlu1 %v1333_v24 }
 0xbc1   :  { %1342 = vrot.lane.b32.xlu0 %v2444_v37, %s2055_s25 }
 0xbc3   :  { %v1140_v28 = vpop.permute.xlu0 %1139 }
 0xbc4   :  { %v1145_v29 = vsel %vm73_vm0, %v1140_v28, 0 }
 0xbc5   :  { %1154 = vmatpush.bf16.msrb.mxu3 %v1145_v29 }
 0xbc7   :  { %1251 = vrot.lane.b32.xlu2 %v2450_v44, %s2054_s24 }
 0xbd1   :  { %v1320_v25 = vpop.xlane.xlu2 %1319 }
 0xbd2   :  { %v1324_v57 = vsub.f32 %v2516_v27, %v1320_v25 }
 0xbd4   :  { %v1326_v30 = vmul.f32 1.442695, %v1324_v57 }
 0xbd6   :  { %1363 = vrot.lane.b32.xlu1 %v2450_v44, %s2055_s25  ;;  %1990 = vpow2.f32 %v1326_v30 }
 0xbd9   :  { %v1231_v32 = vpop.permute.xlu2 %1230 }
 0xbda   :  { %v1236_v44 = vsel %vm73_vm0, %v1231_v32, 0  ;;  %v1866_v32 = vld [vmem:[%s2660_s5 + $0x18] sm:$0xff] }
 0xbdb   :  { %1441 = vmatpush.bf16.msra.mxu0 %v1866_v32 }
 0xbdc   :  { %v1991_v31 = vpop.eup %1990 }
 0xbdd   :  { %v1330_v18 = vsel %vm212_vm12, %v1991_v31, 0.0 }
 0xbf0   :  { %1331 = vadd.xlane.f32.xlu2 %v1330_v18 }
 0xc08   :  { %v996_v37 = vpop.xlane.xlu1 %995 }
 0xc09   :  { %1992 = vrcp.f32 %v996_v37 }
 0xc0f   :  { %v1993_v34 = vpop.eup %1992 }
 0xc10   :  { %v1002_v33 = vmul.f32 %v1993_v34, %v2522_v51  ;;  %v1865_v34 = vld [vmem:[%s2660_s5 + $0x10] sm:$0xff] }
 0xc11   :  { %1442 = vmatpush.bf16.msra.mxu0 %v1865_v34 }
 0xc12   :  { %v1004_v38 = vpack.c.bf16 %v1002_v33, %v1002_v33  ;;  %v999_v40 = vpop.xlane.xlu2 %998 }
 0xc13   :  { %1994 = vrcp.f32 %v999_v40 }
 0xc14   :  { %1783 = vmatmul.msk.bf16.vlgmr.msra.gmra.mxu2 %vm212_vm12, %v1004_v38 }
 0xc15   :  { %1245 = vmatpush.bf16.msra.mxu2 %v1236_v44 }
 0xc19   :  { %v1995_v35 = vpop.eup %1994 }
 0xc1a   :  { %v1003_v43 = vmul.f32 %v1995_v35, %v2527_v56  ;;  %v1108_v46 = vpop.xlane.xlu2 %1107 }
 0xc1b   :  { %1996 = vrcp.f32 %v1108_v46 }
 0xc1c   :  { %v1005_v27 = vpack.c.bf16 %v1003_v43, %v1003_v43 }
 0xc1e   :  { %1784 = vmatmul.msk.bf16.vlgmr.msra.gmra.mxu3 %vm212_vm12, %v1005_v27 }
 0xc20   :  { %v1223_v51 = vpop.xlane.xlu0 %1222 }
 0xc21   :  { %v1997_v7 = vpop.eup %1996 }
 0xc22   :  { %v1114_v49 = vmul.f32 %v1997_v7, %v1981_v0  ;;  %v1111_v62 = vpop.xlane.xlu2 %1110 }
 0xc23   :  { %1998 = vrcp.f32 %v1111_v62 }
 0xc24   :  { %v1116_v47 = vpack.c.bf16 %v1114_v49, %v1114_v49 }
 0xc26   :  { %1787 = vmatmul.msk.bf16.vlgmr.msrb.gmra.mxu2 %vm212_vm12, %v1116_v47 }
 0xc28   :  { %v1220_v45 = vpop.xlane.xlu1 %1219 }
 0xc29   :  { %v1999_v48 = vpop.eup %1998  ;;  %2000 = vrcp.f32 %v1220_v45 }
 0xc2a   :  { %v1115_v50 = vmul.f32 %v1999_v48, %v1983_v26  ;;  %v1252_v22 = vpop.permute.xlu2 %1251  ;;  %2002 = vrcp.f32 %v1223_v51 }
 0xc2b   :  { %v1257_v42 = vsel %vm73_vm0, %v1252_v22, 0 }
 0xc2c   :  { %v1117_v39 = vpack.c.bf16 %v1115_v50, %v1115_v50  ;;  %1266 = vmatpush.bf16.msra.mxu3 %v1257_v42 }
 0xc2e   :  { %1788 = vmatmul.msk.bf16.vlgmr.msrb.gmra.mxu3 %vm212_vm12, %v1117_v39 }
 0xc2f   :  { %v2001_v53 = vpop.eup %2000 }
 0xc30   :  { %v1226_v3 = vmul.f32 %v2001_v53, %v1987_v12  ;;  %v2003_v58 = vpop.eup %2002  ;;  %v1335_v61 = vpop.xlane.xlu1 %1334 }
 0xc31   :  { %v1227_v59 = vmul.f32 %v2003_v58, %v2532_v5  ;;  %2004 = vrcp.f32 %v1335_v61  ;;  %v1872_v61 = vld [vmem:[%s2662_s7 + $0x38] sm:$0xff] }
 0xc32   :  { %v1228_v56 = vpack.c.bf16 %v1226_v3, %v1226_v3 }
 0xc33   :  { %v1343_v55 = vpop.permute.xlu0 %1342  ;;  %v1229_v60 = vpack.c.bf16 %v1227_v59, %v1227_v59 }
 0xc34   :  { %v1348_v14 = vsel %vm73_vm0, %v1343_v55, 0 }
 0xc35   :  { %1357 = vmatpush.bf16.msrb.mxu2 %v1348_v14 }
 0xc36   :  { %1791 = vmatmul.msk.bf16.vlgmr.msra.gmra.mxu2 %vm212_vm12, %v1228_v56 }
 0xc37   :  { %v2005_v63 = vpop.eup %2004 }
 0xc38   :  { %v1339_v0 = vmul.f32 %v2005_v63, %v2539_v41 }
 0xc39   :  { %1570 = vmatpush.bf16.msra.mxu2 %v1872_v61 }
 0xc3a   :  { %v1341_v2 = vpack.c.bf16 %v1339_v0, %v1339_v0 }
 0xc3e   :  { %1792 = vmatmul.msk.bf16.vlgmr.msra.gmra.mxu3 %vm212_vm12, %v1229_v60  ;;  %v1867_v60 = vld [vmem:[%s2661_s6 + $0x10] sm:$0xff] }
 0xc48   :  { %v1364_v23 = vpop.permute.xlu1 %1363 }
 0xc49   :  { %v1369_v1 = vsel %vm73_vm0, %v1364_v23, 0 }
 0xc4a   :  { %1378 = vmatpush.bf16.msrb.mxu3 %v1369_v1 }
 0xc4e   :  { %1796 = vmatmul.msk.bf16.vlgmr.msrb.gmra.mxu3 %vm212_vm12, %v1341_v2 }
 0xc63   :  { %v1332_v4 = vpop.xlane.xlu2 %1331 }
 0xc64   :  { %2006 = vrcp.f32 %v1332_v4 }
 0xc6a   :  { %v2007_v26 = vpop.eup %2006 }
 0xc6b   :  { %v1338_v6 = vmul.f32 %v2007_v26, %v1991_v31 }
 0xc6d   :  { %v1340_v5 = vpack.c.bf16 %v1338_v6, %v1338_v6 }
 0xc6f   :  { %1795 = vmatmul.msk.bf16.vlgmr.msrb.gmra.mxu2 %vm212_vm12, %v1340_v5 }
 0xc97   :  { %v1023_v8 = vpop.f32.mrf.mxu2 }
 0xc9f   :  { %v1025_v9 = vpop.f32.mrf.mxu2 }
 0xca1   :  { %v1044_v10 = vpop.f32.mrf.mxu3 }
 0xca9   :  { %v1046_v11 = vpop.f32.mrf.mxu3  ;;  %v1135_v12 = vpop.f32.mrf.mxu2 }
 0xcb1   :  { %v1137_v13 = vpop.f32.mrf.mxu2  ;;  %v1156_v15 = vpop.f32.mrf.mxu3 }
 0xcb2   :  { %v1907_v20 = vpack.i.bf16 %v1156_v15, %v1135_v12 }
 0xcb4   :  { %1908 = vrot.lane.b32.xlu0 %v1907_v20, %s2056_s26  ;;  %v1927_v20 = vld [vmem:[%s2663_s8 + $0x3] ss:$0 sm:$0xff] }
 0xcb9   :  { %v1158_v21 = vpop.f32.mrf.mxu3  ;;  %v1247_v41 = vpop.f32.mrf.mxu2 }
 0xcc1   :  { %v1249_v24 = vpop.f32.mrf.mxu2  ;;  %v1268_v28 = vpop.f32.mrf.mxu3 }
 0xcc2   :  { %v1912_v29 = vpack.i.bf16 %v1268_v28, %v1247_v41 }
 0xcc4   :  { %1913 = vrot.lane.b32.xlu0 %v1912_v29, %s2057_s0 }
 0xcc9   :  { %v1270_v25 = vpop.f32.mrf.mxu3 }
 0xcd1   :  { %v1380_v57 = vpop.f32.mrf.mxu3 }
 0xcd9   :  { %v1382_v30 = vpop.f32.mrf.mxu3 }
 0xcda   :  { %v1870_v30 = vld [vmem:[%s2662_s7 + $0x28] sm:$0xff] }
 0xcf2   :  { %v1359_v31 = vpop.f32.mrf.mxu2 }
 0xcf3   :  { %v1917_v18 = vpack.i.bf16 %v1380_v57, %v1359_v31  ;;  %v1871_v57 = vld [vmem:[%s2662_s7 + $0x30] sm:$0xff]  ;;  %v1869_v31 = vld [vmem:[%s2662_s7 + $0x20] sm:$0xff] }
 0xcf4   :  { %1571 = vmatpush.bf16.msra.mxu2 %v1871_v57 }
 0xcf5   :  { %1918 = vrot.lane.b32.xlu2 %v1917_v18, %s2058_s14 }
 0xcf8   :  { %1572 = vmatpush.bf16.msra.mxu2 %v1870_v30 }
 0xcfa   :  { %v1361_v37 = vpop.f32.mrf.mxu2 }
 0xcfc   :  { %1573 = vmatpush.bf16.msra.mxu2 %v1869_v31 }
 0xd26   :  { %v1909_v33 = vpop.permute.xlu0 %1908 }
 0xd27   :  { %v1911_v40 = vunpack.i.h.bf16 %v1909_v33  ;;  %v1910_v44 = vunpack.i.l.bf16 %v1909_v33 }
 0xd29   :  { %v1409_v27 = vsel %vm212_vm12, %v1044_v10, %v1911_v40  ;;  %v1408_v7 = vsel %vm212_vm12, %v1023_v8, %v1910_v44 }
 0xd36   :  { %v1914_v38 = vpop.permute.xlu0 %1913 }
 0xd37   :  { %v1916_v35 = vunpack.i.h.bf16 %v1914_v38  ;;  %v1915_v43 = vunpack.i.l.bf16 %v1914_v38 }
 0xd39   :  { %v1411_v47 = vsel %vm684_vm13, %v1409_v27, %v1916_v35  ;;  %v1410_v45 = vsel %vm684_vm13, %v1408_v7, %v1915_v43 }
 0xd4f   :  { %v1919_v46 = vpop.permute.xlu2 %1918 }
 0xd50   :  { %v1921_v49 = vunpack.i.h.bf16 %v1919_v46  ;;  %v1920_v62 = vunpack.i.l.bf16 %v1919_v46 }
 0xd52   :  { %v1413_v48 = vsel %vm687_vm14, %v1411_v47, %v1921_v49  ;;  %v1412_v50 = vsel %vm687_vm14, %v1410_v45, %v1920_v62  ;;  %v1655_v45 = vld [vmem:[%s2664_s9 + $0x18] sm:$0xff] }
 0xd53   :  { %v1414_v22 = vpack.c.bf16 %v1413_v48, %v1412_v50  ;;  %v1654_v48 = vld [vmem:[%s2664_s9 + $0x10] sm:$0xff]  ;;  %1673 = vmatpush.msrb.mxu0 %v1655_v45 }
 0xd55   :  { %1809 = vmatmul.msk.bf16.vlgmr.msra.gmra.mxu0 %vm126_vm4, %v1414_v22  ;;  %v1653_v22 = vld [vmem:[%s2664_s9 + $0x8] sm:$0xff] }
 0xd56   :  { %1674 = vmatpush.msrb.mxu0 %v1654_v48 }
 0xd58   :  { %1675 = vmatpush.msrb.mxu0 %v1653_v22 }
 0xdd2   :  { %v1444_v51 = vpop.f32.mrf.mxu0 }
 0xdd3   :  { %v2585_v42 = vadd.f32 %v1444_v51, %v2419_v52  ;;  %v1868_v52 = vld [vmem:[%s2661_s6 + $0x18] sm:$0xff] }
 0xdd4   :  { %1519 = vmatpush.bf16.msra.mxu1 %v1868_v52 }
 0xdd5   :  { %v1453_v39 = vmul.f32 %v2585_v42, %v2585_v42 }
 0xdd7   :  { %v1455_v53 = vsel %vm126_vm4, %v1453_v39, 0.0 }
 0xdd8   :  { %1456 = vadd.xlane.f32.xlu1 %v1455_v53  ;;  %1520 = vmatpush.bf16.msra.mxu1 %v1867_v60  ;;  %v1624_v60 = vshrl.u32 %v39_v16, 7 }
 0xdda   :  { %v1446_v3 = vpop.f32.mrf.mxu0 }
 0xddb   :  { %v2591_v55 = vadd.f32 %v1446_v3, %v2425_v54 }
 0xddd   :  { %v1454_v56 = vmul.f32 %v2591_v55, %v2591_v55 }
 0xddf   :  { %v1458_v14 = vsel %vm126_vm4, %v1454_v56, 0.0 }
 0xde0   :  { %1459 = vadd.xlane.f32.xlu0 %v1458_v14 }
 0xe4b   :  { %v1457_v58 = vpop.xlane.xlu1 %1456 }
 0xe4c   :  { %v1461_v59 = vmul.f32 %v1457_v58, %v2181_v36 }
 0xe4e   :  { %v1463_v54 = vadd.f32 1e-06, %v1461_v59 }
 0xe50   :  { %2008 = vrsqrt.f32 %v1463_v54  ;;  %vm1471_vm12 = vweird.f32 %v1463_v54 }
 0xe53   :  { %v1460_v63 = vpop.xlane.xlu0 %1459 }
 0xe54   :  { %v1462_v0 = vmul.f32 %v1460_v63, %v2181_v36 }
 0xe56   :  { %v2009_v23 = vpop.eup %2008  ;;  %v1464_v1 = vadd.f32 1e-06, %v1462_v0 }
 0xe57   :  { %v1466_v2 = vmul.f32 %v2009_v23, %v1463_v54  ;;  %vm1472_vm0 = vweird.f32 %v2009_v23 }
 0xe58   :  { %2010 = vrsqrt.f32 %v1464_v1  ;;  %vm1473_vm14 = vmor %vm1471_vm12, %vm1472_vm0  ;;  %vm1481_vm3 = vweird.f32 %v1464_v1 }
 0xe59   :  { %v1467_v4 = vmul.f32 %v2009_v23, %v1466_v2 }
 0xe5b   :  { %v1468_v26 = vmul.f32 0.5, %v1467_v4  ;;  %v1928_v4 = vld [vmem:[%s2663_s8 + $0x4] ss:$0 sm:$0xff]  ;;  %s1687_s8 = sshll.u32 %s2059_s29, 4  ;;  %s1688_s8 = int_to_ptr.vmem [resolvable:$true] %s1687_s8 }
 0xe5d   :  { %v1469_v6 = vsub.f32 1.5, %v1468_v26 }
 0xe5e   :  { %v2011_v5 = vpop.eup %2010 }
 0xe5f   :  { %v1476_v8 = vmul.f32 %v2011_v5, %v1464_v1  ;;  %v1470_v9 = vmul.f32 %v2009_v23, %v1469_v6  ;;  %vm1482_vm2 = vweird.f32 %v2011_v5 }
 0xe60   :  { %vm1483_vm5 = vmor %vm1481_vm3, %vm1482_vm2 }
 0xe61   :  { %v1477_v10 = vmul.f32 %v2011_v5, %v1476_v8  ;;  %v1474_v12 = vsel %vm1473_vm14, %v2009_v23, %v1470_v9  ;;  %v1625_v23 = vmul.u32 8, %v1624_v60  ;;  %v1929_v9 = vld [vmem:[%s2664_s9 + $0x20] ss:$0 sm:$0xff] }
 0xe62   :  { %v1485_v21 = vmul.f32 %v1474_v12, %v2585_v42 }
 0xe63   :  { %v1478_v11 = vmul.f32 0.5, %v1477_v10  ;;  %vm1626_vm15 = vcmp.eq.s32.totalorder %v2162_v17, %v1625_v23 }
 0xe64   :  { %v1490_v28 = vmul.f32 %v1927_v20, %v1485_v21 }
 0xe65   :  { %v1479_v13 = vsub.f32 1.5, %v1478_v11 }
 0xe67   :  { %v1480_v15 = vmul.f32 %v2011_v5, %v1479_v13 }
 0xe69   :  { %v1484_v41 = vsel %vm1483_vm5, %v2011_v5, %v1480_v15  ;;  %v1850_v5 = vsel %vm1626_vm15, 1.0, %v2043_v19 }
 0xe6a   :  { %v1486_v24 = vmul.f32 %v1484_v41, %v2591_v55 }
 0xe6c   :  { %v1491_v29 = vmul.f32 %v1927_v20, %v1486_v24 }
 0xe6e   :  { %v1492_v25 = vpack.c.bf16 %v1491_v29, %v1490_v28 }
 0xe70   :  { %1823 = vmatmul.msk.bf16.vlgmr.msra.gmra.mxu1 %vm126_vm4, %v1492_v25 }
 0xeed   :  { %v1522_v18 = vpop.f32.mrf.mxu1 }
 0xeee   :  { %v1527_v32 = vmax.f32 %v1522_v18, 0.0 }
 0xef5   :  { %v1524_v37 = vpop.f32.mrf.mxu1 }
 0xef6   :  { %v1528_v34 = vmax.f32 %v1524_v37, 0.0 }
 0xef8   :  { %v1529_v33 = vpack.c.bf16 %v1528_v34, %v1527_v32 }
 0xefa   :  { %1848 = vmatmul.msk.bf16.vlgmr.msra.gmra.mxu2 %vm836_vm7, %v1529_v33 }
 0xf7d   :  { %v1575_v38 = vpop.f32.mrf.mxu2 }
 0xf7e   :  { %v1580_v40 = vadd.f32 %v1575_v38, %v2585_v42  ;;  %v1652_v42 = vld [vmem:[%s2664_s9] sm:$0xff] }
 0xf7f   :  { %1676 = vmatpush.msrb.mxu0 %v1652_v42 }
 0xf80   :  { %v1584_v44 = vmul.f32 %v1580_v40, %v1580_v40 }
 0xf82   :  { %v1586_v35 = vsel %vm126_vm4, %v1584_v44, 0.0 }
 0xf83   :  { %1587 = vadd.xlane.f32.xlu1 %v1586_v35 }
 0xf85   :  { %v1577_v43 = vpop.f32.mrf.mxu2 }
 0xf86   :  { %v1581_v46 = vadd.f32 %v1577_v43, %v2591_v55 }
 0xf88   :  { %v1585_v27 = vmul.f32 %v1581_v46, %v1581_v46 }
 0xf8a   :  { %v1589_v7 = vsel %vm126_vm4, %v1585_v27, 0.0 }
 0xf8b   :  { %1590 = vadd.xlane.f32.xlu2 %v1589_v7 }
 0xff6   :  { %v1588_v49 = vpop.xlane.xlu1 %1587 }
 0xff7   :  { %v1592_v62 = vmul.f32 %v1588_v49, %v2181_v36 }
 0xff9   :  { %v1594_v47 = vadd.f32 1e-06, %v1592_v62 }
 0xffb   :  { %2012 = vrsqrt.f32 %v1594_v47  ;;  %vm1602_vm7 = vweird.f32 %v1594_v47 }
 0xffe   :  { %v1591_v50 = vpop.xlane.xlu2 %1590 }
 0xfff   :  { %v1593_v51 = vmul.f32 %v1591_v50, %v2181_v36 }
0x1001   :  { %v2013_v39 = vpop.eup %2012  ;;  %v1595_v53 = vadd.f32 1e-06, %v1593_v51 }
0x1002   :  { %v1597_v3 = vmul.f32 %v2013_v39, %v1594_v47  ;;  %vm1603_vm6 = vweird.f32 %v2013_v39 }
0x1003   :  { %2014 = vrsqrt.f32 %v1595_v53  ;;  %vm1604_vm9 = vmor %vm1602_vm7, %vm1603_vm6  ;;  %vm1612_vm10 = vweird.f32 %v1595_v53 }
0x1004   :  { %v1598_v55 = vmul.f32 %v2013_v39, %v1597_v3 }
0x1006   :  { %v1599_v56 = vmul.f32 0.5, %v1598_v55 }
0x1008   :  { %v1600_v52 = vsub.f32 1.5, %v1599_v56 }
0x1009   :  { %v2015_v14 = vpop.eup %2014 }
0x100a   :  { %v1607_v58 = vmul.f32 %v2015_v14, %v1595_v53  ;;  %v1601_v36 = vmul.f32 %v2013_v39, %v1600_v52  ;;  %vm1613_vm8 = vweird.f32 %v2015_v14 }
0x100b   :  { %vm1614_vm11 = vmor %vm1612_vm10, %vm1613_vm8 }
0x100c   :  { %v1608_v59 = vmul.f32 %v2015_v14, %v1607_v58  ;;  %v1605_v0 = vsel %vm1604_vm9, %v2013_v39, %v1601_v36 }
0x100d   :  { %v1616_v26 = vmul.f32 %v1605_v0, %v1580_v40 }
0x100e   :  { %v1609_v54 = vmul.f32 0.5, %v1608_v59 }
0x100f   :  { %v1621_v6 = vmul.f32 %v1928_v4, %v1616_v26 }
0x1010   :  { %v1610_v61 = vsub.f32 1.5, %v1609_v54 }
0x1012   :  { %v1611_v63 = vmul.f32 %v2015_v14, %v1610_v61 }
0x1014   :  { %v1615_v1 = vsel %vm1614_vm11, %v2015_v14, %v1611_v63 }
0x1015   :  { %v1617_v2 = vmul.f32 %v1615_v1, %v1581_v46 }
0x1017   :  { %v1622_v16 = vmul.f32 %v1928_v4, %v1617_v2 }
0x1019   :  { %1646 = vmatpush.msra.mxu3 %v1622_v16 }
0x101b   :  { %1647 = vmatpush.msra.mxu3 %v1621_v6 }
0x101c   :  { %1851 = vmatmul.msk.f32.vlgmr.msra.gmra.mxu3 %vm684_vm13, %v1850_v5 }
0x109f   :  { %v1649_v8 = vpop.f32.mrf.mxu3 }
0x10a0   :  { %1852 = vmatmul.msk.f32.vlgmr.msrb.gmra.mxu0 %vm126_vm4, %v1649_v8 }
0x111d   :  { %v1678_v17 = vpop.f32.mrf.mxu0 }
0x111e   :  { %v1679_v10 = vadd.f32 %v1929_v9, %v1678_v17 }
0x1120   :  { %1681 = vst [vmem:[#allocation2] sm:$0x3] %v1679_v10 }
0x1121   :  { %1692 = dma.vmem_to_hbm [thread:$0]  %s1688_s8, 32, %s1690_s11, [#allocation3]  }
0x1122   :  { %2040 = dma.done.wait [#allocation3], 32  }
0x1123   :  { %2041 = vsyncadd [#allocation3], 4294967264 }
0x1124   :  { %1697 = vsyncpa [#allocation3], 1 }

</bundles_post_ra>
